<compile_context>
chip_gen: v6e
topology: v6e:2x2x1
jax: 0.10.0
libtpu: 0.0.40
codegen_flags: <defaults>
</compile_context>

<pallas_src>
import math

import jax
import jax.numpy as jnp
from jax.experimental import pallas as pl
from jax.experimental.pallas import tpu as pltpu

# ----------------------------- constants ------------------------------------
N_FILTERS = 64
N_INTERACTIONS = 2
U_MAX = 5.0
GAMMA = 10.0
STEP = 0.1
N_RBF = int(round(U_MAX / STEP)) + 1      # 51 gaussian centers: 0.0 .. 5.0
N_RBF_PAD = 64                            # lane-friendly padded RBF width
CDFT_DIM = 10
CDFT_PAD = 16                             # padded contraction dim for mlp_u0
OUTPUT_DIM = 1
LOG2 = math.log(2.0)

_VMEM = pl.BlockSpec(memory_space=pltpu.MemorySpace.VMEM)

# ---- packed-slab static layouts (row offsets; all multiples of 16) ----------
# emb slab (f32, [112, 64])
_EMB_Z = 0            # rows 0:100
_EMB_SOLV = 104       # rows 104:108
_EMB_ROWS = 112

# w64 slab (bf16, [784, 64])
_W64_SW1 = 0          # mlp_solv W1            (64)
_W64_U0W1 = 64        # mlp_u0 W1, padded 10->16
_W64_U0W2 = 80        # mlp_u0 W2              (64)
_W64_U12W2 = 144      # vstack(u1W2, u2W2)     (128)
_W64_U3W1 = 272       # mlp_u3 W1              (64)
_W64_U3W2 = 336       # mlp_u3 W2              (64)
_W64_INTER = 400      # + 192*i: lin1 W (64) | mlp W1 (64) | mlp W2 (64)
_W64_ROWS = _W64_INTER + 192 * N_INTERACTIONS          # 784

# w128 slab (bf16, [320, 128])
_W128_U12W1 = 0       # blockdiag(u1W1, u2W1)  (128)
_W128_FW1 = 128       # hstack(filter0 W1 pad, filter1 W1 pad)  (64)
_W128_FW2 = 192       # blockdiag(filter0 W2, filter1 W2)       (128)
_W128_ROWS = 320

# w32 slab (bf16, [320, 32])
_W32_SW2 = 0          # mlp_solv W2            (64)
_W32_PW2 = 64         # post_mlp W2            (256)
_W32_ROWS = 320

# bias slab (f32, [24, 256]); each row holds one (zero-padded) bias / vector
_B_SB1, _B_SB2, _B_U0B1, _B_U0B2 = 0, 1, 2, 3
_B_U12B1, _B_U12B2, _B_U3B1, _B_U3B2 = 4, 5, 6, 7
_B_FB1, _B_FB2 = 8, 9
_B_PB1, _B_PB2, _B_PB3, _B_PW3 = 10, 11, 12, 13
_B_INTER = 14         # + 3*i: lin1 b | mlp b1 | mlp b2
_B_ROWS = 24


# ----------------------------- in-kernel helpers -----------------------------
def _ssplus(x):
    # shifted softplus: softplus(x) - log(2); numerically stable, kept f32
    return jnp.maximum(x, 0.0) + jnp.log1p(jnp.exp(-jnp.abs(x))) - LOG2


# ----------------------------- fused kernel ----------------------------------
def _fused_forward_kernel(z_ref, src_ref, dst_ref, batch_ref, nuc_ref, solv_ref,
                          d_ref, cdft_ref,
                          emb_ref, w64_ref, w128_ref, pw1_ref, w32_ref, bias_ref,
                          o_ref):
    f32 = jnp.float32
    bf16 = jnp.bfloat16
    n_nodes = z_ref.shape[0]            # N
    n_edges = src_ref.shape[0]          # E
    n_graphs = solv_ref.shape[0]        # B

    def bias(row, width):
        # static [1, width] f32 slice of the packed bias slab
        return bias_ref[row:row + 1, 0:width]

    def mm(a, w):
        # activation cast to bf16; weight slab is already bf16; f32 accumulate
        return jnp.dot(a.astype(bf16), w, preferred_element_type=f32)

    def dense(a, w_ref, r0, rows, brow):
        # a @ w_ref[r0:r0+rows, :] + bias_row  (bf16 MXU operands, f32 accum)
        w = w_ref[r0:r0 + rows, :]
        return mm(a, w) + bias(brow, w_ref.shape[1])

    def sel_dot(onehot, payload):
        # exact 0/1 selection matrix as bf16 MXU operand; payload rounded to
        # bf16 (it was produced by bf16 matmuls anyway); f32 accumulation
        return jnp.dot(onehot.astype(bf16), payload.astype(bf16),
                       preferred_element_type=f32)

    # ---- embedding lookups: one-hot gathers, tables kept f32 (exact values) ----
    oh_z = (z_ref[...] ==
            jax.lax.broadcasted_iota(jnp.int32, (n_nodes, 100), 1)).astype(f32)
    x = jnp.dot(oh_z, emb_ref[_EMB_Z:_EMB_Z + 100, :],
                preferred_element_type=f32)                          # [N, 64]
    oh_sv = (solv_ref[...] ==
             jax.lax.broadcasted_iota(jnp.int32, (n_graphs, 4), 1)).astype(f32)
    solv = jnp.dot(oh_sv, emb_ref[_EMB_SOLV:_EMB_SOLV + 4, :],
                   preferred_element_type=f32)                       # [B, 64]

    # ---- mlp_solv ----
    solv = _ssplus(dense(solv, w64_ref, _W64_SW1, 64, _B_SB1))
    solv = dense(solv, w32_ref, _W32_SW2, 64, _B_SB2)                # [B, 32]

    # ---- u = mlp_u0(cdft)  (cdft padded 10 -> 16, weight pad rows are zero) ----
    u = _ssplus(dense(cdft_ref[...], w64_ref, _W64_U0W1, CDFT_PAD, _B_U0B1))
    u = dense(u, w64_ref, _W64_U0W2, 64, _B_U0B2)                    # [B, 64]

    # ---- graph-structure one-hots (built once, reused by both interactions) ----
    oh_src = (src_ref[...] ==
              jax.lax.broadcasted_iota(jnp.int32, (n_edges, n_nodes), 1)).astype(f32)
    oh_dst_t = (dst_ref[...] ==
                jax.lax.broadcasted_iota(jnp.int32, (n_nodes, n_edges), 0)).astype(f32)
    oh_batch_t = (batch_ref[...] ==
                  jax.lax.broadcasted_iota(jnp.int32, (n_graphs, n_nodes), 0)).astype(f32)
    counts = jnp.maximum(jnp.sum(oh_batch_t, axis=1, keepdims=True), 1.0)  # [B, 1]
    oh_nuc = (nuc_ref[...] ==
              jax.lax.broadcasted_iota(jnp.int32, (n_graphs, n_nodes), 1)).astype(f32)

    # ---- Gaussian RBF + BOTH interactions' filter MLPs, hoisted & fused ----
    # filter weights are hstacked / block-diagonal so wf_both[:, 64i:64(i+1)]
    # is exactly interaction i's filter output (RBF padded rows are zero).
    mu = (jax.lax.broadcasted_iota(jnp.int32, (n_edges, N_RBF_PAD), 1)
          .astype(f32) * STEP)
    dd = d_ref[...] - mu
    rbf = jnp.exp(-GAMMA * dd * dd)                                  # [E, 64]
    wf = _ssplus(dense(rbf, w128_ref, _W128_FW1, 64, _B_FB1))
    wf_both = dense(wf, w128_ref, _W128_FW2, 128, _B_FB2)            # [E, 128]

    for i in range(N_INTERACTIONS):
        wbase = _W64_INTER + 192 * i
        bbase = _B_INTER + 3 * i

        # Interaction: m = lin_1(x); v = cfconv(m); v = mlp(v); x = x + v
        m = dense(x, w64_ref, wbase, 64, bbase)                      # [N, 64]
        wf_i = wf_both[:, 64 * i:64 * (i + 1)]                       # [E, 64]
        msgs = sel_dot(oh_src, m) * wf_i                             # gather * filter
        v = sel_dot(oh_dst_t, msgs)                                  # scatter-sum [N,64]
        v = _ssplus(dense(v, w64_ref, wbase + 64, 64, bbase + 1))
        v = dense(v, w64_ref, wbase + 128, 64, bbase + 2)
        x = x + v

        # u-update: u += mlp_u3(mlp_u1(scatter_mean(x, batch)) + mlp_u2(u))
        # mlp_u1/mlp_u2 fused via lane-concat + block-diag / stacked weights
        # (SSPlus stays per-branch because the halves are concatenated, not summed)
        x_mean = sel_dot(oh_batch_t, x) / counts                     # [B, 64]
        h = jnp.concatenate([x_mean, u], axis=1)                     # [B, 128]
        h = _ssplus(dense(h, w128_ref, _W128_U12W1, 128, _B_U12B1))
        du = dense(h, w64_ref, _W64_U12W2, 128, _B_U12B2)            # [B, 64]
        du = _ssplus(dense(du, w64_ref, _W64_U3W1, 64, _B_U3B1))
        du = dense(du, w64_ref, _W64_U3W2, 64, _B_U3B2)
        u = u + du

    # ---- nuclear-site gather + post_mlp ----
    x_nuc = sel_dot(oh_nuc, x)                                       # [B, 64]
    # first layer as split-weight sum == concat([x_nuc, u, solv]) @ Wp1
    h = dense(x_nuc, pw1_ref, 0, 64, _B_PB1)
    h = h + mm(u, pw1_ref[64:128, :])
    h = h + mm(solv, pw1_ref[128:160, :])
    h = _ssplus(h)
    h = _ssplus(dense(h, w32_ref, _W32_PW2, 256, _B_PB2))            # [B, 32]
    # final Linear(32, 1) fully in f32: lane-reduce against the stored weight row
    o_ref[...] = (jnp.sum(h * bias(_B_PW3, 32), axis=1, keepdims=True)
                  + bias(_B_PB3, 1))                                 # [B, 1]


# ----------------------------- parameters -----------------------------------
def _linear_params(key, fan_in, fan_out):
    k1, k2 = jax.random.split(key)
    lim = 1.0 / math.sqrt(fan_in)
    w = jax.random.uniform(k1, (fan_in, fan_out), jnp.float32, -lim, lim)
    b = jax.random.uniform(k2, (fan_out,), jnp.float32, -lim, lim)
    return w, b


def _mlp2_params(key, d_in, d_hid, d_out):
    k1, k2 = jax.random.split(key)
    w1, b1 = _linear_params(k1, d_in, d_hid)
    w2, b2 = _linear_params(k2, d_hid, d_out)
    return (w1, b1, w2, b2)


def init_params(key):
    keys = jax.random.split(key, 32)
    ki = iter(keys)
    params = {}

    emb_z = 0.1 * jax.random.normal(next(ki), (100, N_FILTERS), jnp.float32)
    emb_z = emb_z.at[0].set(0.0)  # padding_idx=0
    params["emb_z"] = emb_z
    params["emb_solv"] = 0.1 * jax.random.normal(next(ki), (4, 64), jnp.float32)

    params["mlp_solv"] = _mlp2_params(next(ki), 64, 64, 32)
    params["mlp_u0"] = _mlp2_params(next(ki), CDFT_DIM, N_FILTERS, N_FILTERS)
    params["mlp_u1"] = _mlp2_params(next(ki), N_FILTERS, N_FILTERS, N_FILTERS)
    params["mlp_u2"] = _mlp2_params(next(ki), N_FILTERS, N_FILTERS, N_FILTERS)
    params["mlp_u3"] = _mlp2_params(next(ki), N_FILTERS, N_FILTERS, N_FILTERS)

    # post_mlp: Linear(160,256) -> SSPlus -> Linear(256,32) -> SSPlus -> Linear(32,1)
    kp1, kp2, kp3 = jax.random.split(next(ki), 3)
    pw1, pb1 = _linear_params(kp1, N_FILTERS + N_FILTERS + 32, 256)
    pw2, pb2 = _linear_params(kp2, 256, 32)
    pw3, pb3 = _linear_params(kp3, 32, OUTPUT_DIM)
    params["post_mlp"] = (pw1, pb1, pw2, pb2, pw3, pb3)

    interactions = []
    for _ in range(N_INTERACTIONS):
        p = {
            "lin1": _linear_params(next(ki), N_FILTERS, N_FILTERS),
            "mlp": _mlp2_params(next(ki), N_FILTERS, N_FILTERS, N_FILTERS),
            "filter": _mlp2_params(next(ki), N_RBF, N_FILTERS, N_FILTERS),
        }
        interactions.append(p)
    params["interactions"] = interactions
    return params


# ----------------------------- parameter packing -----------------------------
def pack_params(params):
    """Pack all weights/biases into a handful of VMEM slabs (done once).

    Dense matmul weights are pre-cast to bf16 (MXU operands); the embedding
    tables and all biases stay f32 (biases feed f32 elementwise adds/SSPlus).
    """
    assert N_INTERACTIONS == 2, "slab layout assumes 2 interactions"
    f32 = jnp.float32

    sw1, sb1, sw2, sb2 = params["mlp_solv"]
    u0w1, u0b1, u0w2, u0b2 = params["mlp_u0"]
    u1w1, u1b1, u1w2, u1b2 = params["mlp_u1"]
    u2w1, u2b1, u2w2, u2b2 = params["mlp_u2"]
    u3w1, u3b1, u3w2, u3b2 = params["mlp_u3"]
    pw1, pb1, pw2, pb2, pw3, pb3 = params["post_mlp"]

    # ---- embedding slab (f32) ----
    emb = jnp.zeros((_EMB_ROWS, 64), f32)
    emb = emb.at[_EMB_Z:_EMB_Z + 100].set(params["emb_z"])
    emb = emb.at[_EMB_SOLV:_EMB_SOLV + 4].set(params["emb_solv"])

    # ---- 64-column weight slab ----
    w64 = jnp.zeros((_W64_ROWS, 64), f32)
    w64 = w64.at[_W64_SW1:_W64_SW1 + 64].set(sw1)
    w64 = w64.at[_W64_U0W1:_W64_U0W1 + CDFT_DIM].set(u0w1)     # pad 10 -> 16 rows
    w64 = w64.at[_W64_U0W2:_W64_U0W2 + 64].set(u0w2)
    w64 = w64.at[_W64_U12W2:_W64_U12W2 + 64].set(u1w2)         # vstack(u1w2, u2w2)
    w64 = w64.at[_W64_U12W2 + 64:_W64_U12W2 + 128].set(u2w2)
    w64 = w64.at[_W64_U3W1:_W64_U3W1 + 64].set(u3w1)
    w64 = w64.at[_W64_U3W2:_W64_U3W2 + 64].set(u3w2)
    for i, p in enumerate(params["interactions"]):
        base = _W64_INTER + 192 * i
        lw, _ = p["lin1"]
        mw1, _, mw2, _ = p["mlp"]
        w64 = w64.at[base:base + 64].set(lw)
        w64 = w64.at[base + 64:base + 128].set(mw1)
        w64 = w64.at[base + 128:base + 192].set(mw2)

    # ---- 128-column weight slab (block-diag / hstack fusions) ----
    w128 = jnp.zeros((_W128_ROWS, 128), f32)
    w128 = w128.at[_W128_U12W1:_W128_U12W1 + 64, 0:64].set(u1w1)
    w128 = w128.at[_W128_U12W1 + 64:_W128_U12W1 + 128, 64:128].set(u2w1)
    for i, p in enumerate(params["interactions"]):
        fw1, _, fw2, _ = p["filter"]
        c0, c1 = 64 * i, 64 * (i + 1)
        w128 = w128.at[_W128_FW1:_W128_FW1 + N_RBF, c0:c1].set(fw1)  # RBF pad rows zero
        w128 = w128.at[_W128_FW2 + c0:_W128_FW2 + c1, c0:c1].set(fw2)

    # ---- 32-column weight slab ----
    w32 = jnp.zeros((_W32_ROWS, 32), f32)
    w32 = w32.at[_W32_SW2:_W32_SW2 + 64].set(sw2)
    w32 = w32.at[_W32_PW2:_W32_PW2 + 256].set(pw2)

    # ---- bias slab (f32, one bias per row, zero-padded to 256 lanes) ----
    bias = jnp.zeros((_B_ROWS, 256), f32)

    def setb(slab, row, vec):
        vec = jnp.asarray(vec, f32).reshape(-1)
        return slab.at[row, 0:vec.shape[0]].set(vec)

    bias = setb(bias, _B_SB1, sb1)
    bias = setb(bias, _B_SB2, sb2)
    bias = setb(bias, _B_U0B1, u0b1)
    bias = setb(bias, _B_U0B2, u0b2)
    bias = setb(bias, _B_U12B1, jnp.concatenate([u1b1, u2b1]))
    bias = setb(bias, _B_U12B2, u1b2 + u2b2)
    bias = setb(bias, _B_U3B1, u3b1)
    bias = setb(bias, _B_U3B2, u3b2)
    fb1_all = jnp.concatenate([p["filter"][1] for p in params["interactions"]])
    fb2_all = jnp.concatenate([p["filter"][3] for p in params["interactions"]])
    bias = setb(bias, _B_FB1, fb1_all)
    bias = setb(bias, _B_FB2, fb2_all)
    bias = setb(bias, _B_PB1, pb1)
    bias = setb(bias, _B_PB2, pb2)
    bias = setb(bias, _B_PB3, pb3)
    bias = setb(bias, _B_PW3, pw3[:, 0])          # final Linear(32,1) weight as a row
    for i, p in enumerate(params["interactions"]):
        bias = setb(bias, _B_INTER + 3 * i + 0, p["lin1"][1])
        bias = setb(bias, _B_INTER + 3 * i + 1, p["mlp"][1])
        bias = setb(bias, _B_INTER + 3 * i + 2, p["mlp"][3])

    bf16 = jnp.bfloat16
    return {
        "emb": emb,                   # f32  [112, 64]
        "w64": w64.astype(bf16),      # bf16 [784, 64]
        "w128": w128.astype(bf16),    # bf16 [320, 128]
        "pw1": pw1.astype(bf16),      # bf16 [160, 256]
        "w32": w32.astype(bf16),      # bf16 [320, 32]
        "bias": bias,                 # f32  [24, 256]
    }


# ----------------------------- forward --------------------------------------
@jax.jit
def zschnet_cdft_forward(packed, z, edge_index, pos, batch, solvent, nuc_index,
                         cdft):
    n_graphs = solvent.shape[0]

    # Tiny XLA glue: edge distances (elementwise over E scalars).
    src, dst = edge_index[0], edge_index[1]
    diff = pos[src] - pos[dst]
    d = jnp.sqrt(jnp.sum(diff * diff, axis=-1) + 1e-12)              # [E]

    cdft_pad = jnp.zeros((n_graphs, CDFT_PAD), jnp.float32)
    cdft_pad = cdft_pad.at[:, :CDFT_DIM].set(cdft.astype(jnp.float32))

    inputs = [
        z.astype(jnp.int32).reshape(-1, 1),                 # z_ref     [N, 1]
        src.astype(jnp.int32).reshape(-1, 1),                # src_ref   [E, 1]
        dst.astype(jnp.int32).reshape(1, -1),                # dst_ref   [1, E]
        batch.astype(jnp.int32).reshape(1, -1),              # batch_ref [1, N]
        (nuc_index.astype(jnp.int32) - 1).reshape(-1, 1),    # nuc_ref   [B, 1]
        solvent.astype(jnp.int32).reshape(-1, 1),            # solv_ref  [B, 1]
        d.astype(jnp.float32).reshape(-1, 1),                # d_ref     [E, 1]
        cdft_pad,                                            # cdft_ref  [B, 16]
        packed["emb"], packed["w64"], packed["w128"],
        packed["pw1"], packed["w32"], packed["bias"],
    ]

    out = pl.pallas_call(
        _fused_forward_kernel,
        out_shape=jax.ShapeDtypeStruct((n_graphs, OUTPUT_DIM), jnp.float32),
        in_specs=[_VMEM] * len(inputs),
        out_specs=_VMEM,
    )(*inputs)
    return out


# ----------------------------- main -----------------------------------------
if __name__ == "__main__":
    key = jax.random.PRNGKey(0)
    k_param, k_z, k_pos, k_cdft = jax.random.split(key, 4)

    params = init_params(k_param)
    packed = pack_params(params)          # one-time slab packing + bf16 cast

    n_graphs = 2
    nodes_per_graph = 8
    n_nodes = n_graphs * nodes_per_graph          # 16

    z = jax.random.randint(k_z, (n_nodes,), 1, 10).astype(jnp.int32)
    pos = jax.random.normal(k_pos, (n_nodes, 3), jnp.float32) * 2.0
    batch = jnp.repeat(jnp.arange(n_graphs, dtype=jnp.int32), nodes_per_graph)

    # ring edges within each graph, both directions -> E = 32
    src_list, dst_list = [], []
    for g in range(n_graphs):
        base = g * nodes_per_graph
        for i in range(nodes_per_graph):
            j = (i + 1) % nodes_per_graph
            src_list += [base + i, base + j]
            dst_list += [base + j, base + i]
    edge_index = jnp.array([src_list, dst_list], dtype=jnp.int32)  # [2, 32]

    solvent = jnp.array([0, 2], dtype=jnp.int32)          # [B]
    nuc_index = jnp.array([1, 9], dtype=jnp.int32)        # 1-indexed, per module
    cdft = jax.random.normal(k_cdft, (n_graphs, CDFT_DIM), jnp.float32)

    out = zschnet_cdft_forward(
        packed, z, edge_index, pos, batch, solvent, nuc_index, cdft,
    )
    out = jax.block_until_ready(out)

    assert out.shape == (n_graphs, OUTPUT_DIM), out.shape
    assert bool(jnp.all(jnp.isfinite(out)))
    print("KERNEL_OK")
</pallas_src>

<mosaic_0001>
module attributes {stable_mosaic.version = 11 : i64} {
  func.func @_fused_forward_kernel(%arg0: memref<16x1xi32, #tpu.memory_space<vmem>>, %arg1: memref<32x1xi32, #tpu.memory_space<vmem>>, %arg2: memref<1x32xi32, #tpu.memory_space<vmem>>, %arg3: memref<1x16xi32, #tpu.memory_space<vmem>>, %arg4: memref<2x1xi32, #tpu.memory_space<vmem>>, %arg5: memref<2x1xi32, #tpu.memory_space<vmem>>, %arg6: memref<32x1xf32, #tpu.memory_space<vmem>>, %arg7: memref<2x16xf32, #tpu.memory_space<vmem>>, %arg8: memref<112x64xf32, #tpu.memory_space<vmem>>, %arg9: memref<784x64xbf16, #tpu.memory_space<vmem>>, %arg10: memref<320x128xbf16, #tpu.memory_space<vmem>>, %arg11: memref<160x256xbf16, #tpu.memory_space<vmem>>, %arg12: memref<320x32xbf16, #tpu.memory_space<vmem>>, %arg13: memref<24x256xf32, #tpu.memory_space<vmem>>, %arg14: memref<2x1xf32, #tpu.memory_space<vmem>>) attributes {dimension_semantics = [], scalar_prefetch = 0 : i64, scratch_operands = 0 : i64, tpu.core_type = #tpu.core_type<tc>} {
    %c0 = arith.constant 0 : index
    %c0_0 = arith.constant 0 : index
    %0 = vector.load %arg0[%c0, %c0_0] : memref<16x1xi32, #tpu.memory_space<vmem>>, vector<16x1xi32>
    %1 = tpu.iota {dimensions = array<i32: 1>} : vector<16x100xi32>
    %2 = vector.broadcast %0 : vector<16x1xi32> to vector<16x100xi32>
    %3 = arith.cmpi eq, %2, %1 : vector<16x100xi32>
    %4 = arith.extui %3 : vector<16x100xi1> to vector<16x100xi32>
    %5 = arith.sitofp %4 : vector<16x100xi32> to vector<16x100xf32>
    %c0_1 = arith.constant 0 : index
    %c0_2 = arith.constant 0 : index
    %6 = vector.load %arg8[%c0_1, %c0_2] : memref<112x64xf32, #tpu.memory_space<vmem>>, vector<100x64xf32>
    %cst = arith.constant dense<0.000000e+00> : vector<16x64xf32>
    %7 = tpu.matmul %5, %6, %cst {dimension_numbers = #tpu.dot_dimension_numbers<[1], [0], [0], [1], [0, 0, 1, 1], [], []>} : vector<16x100xf32>, vector<100x64xf32>, vector<16x64xf32> -> vector<16x64xf32>
    %c0_3 = arith.constant 0 : index
    %c0_4 = arith.constant 0 : index
    %8 = vector.load %arg5[%c0_3, %c0_4] : memref<2x1xi32, #tpu.memory_space<vmem>>, vector<2x1xi32>
    %9 = tpu.iota {dimensions = array<i32: 1>} : vector<2x4xi32>
    %10 = vector.broadcast %8 : vector<2x1xi32> to vector<2x4xi32>
    %11 = arith.cmpi eq, %10, %9 : vector<2x4xi32>
    %12 = arith.extui %11 : vector<2x4xi1> to vector<2x4xi32>
    %13 = arith.sitofp %12 : vector<2x4xi32> to vector<2x4xf32>
    %c104 = arith.constant 104 : index
    %c0_5 = arith.constant 0 : index
    %14 = vector.load %arg8[%c104, %c0_5] : memref<112x64xf32, #tpu.memory_space<vmem>>, vector<4x64xf32>
    %cst_6 = arith.constant dense<0.000000e+00> : vector<2x64xf32>
    %15 = tpu.matmul %13, %14, %cst_6 {dimension_numbers = #tpu.dot_dimension_numbers<[1], [0], [0], [1], [0, 0, 1, 1], [], []>} : vector<2x4xf32>, vector<4x64xf32>, vector<2x64xf32> -> vector<2x64xf32>
    %c0_7 = arith.constant 0 : index
    %c0_8 = arith.constant 0 : index
    %16 = vector.load %arg9[%c0_7, %c0_8] : memref<784x64xbf16, #tpu.memory_space<vmem>>, vector<64x64xbf16>
    %17 = arith.truncf %15 : vector<2x64xf32> to vector<2x64xbf16>
    %cst_9 = arith.constant dense<0.000000e+00> : vector<2x64xf32>
    %18 = tpu.matmul %17, %16, %cst_9 {dimension_numbers = #tpu.dot_dimension_numbers<[1], [0], [0], [1], [0, 0, 1, 1], [], []>} : vector<2x64xbf16>, vector<64x64xbf16>, vector<2x64xf32> -> vector<2x64xf32>
    %c0_10 = arith.constant 0 : index
    %c0_11 = arith.constant 0 : index
    %19 = vector.load %arg13[%c0_10, %c0_11] : memref<24x256xf32, #tpu.memory_space<vmem>>, vector<1x64xf32>
    %20 = vector.broadcast %19 : vector<1x64xf32> to vector<2x64xf32>
    %21 = arith.addf %18, %20 : vector<2x64xf32>
    %cst_12 = arith.constant 0.000000e+00 : f32
    %22 = vector.broadcast %cst_12 : f32 to vector<2x64xf32>
    %23 = arith.maximumf %21, %22 : vector<2x64xf32>
    %24 = math.absf %21 : vector<2x64xf32>
    %cst_13 = arith.constant 0.000000e+00 : f32
    %25 = vector.broadcast %cst_13 : f32 to vector<2x64xf32>
    %26 = arith.subf %25, %24 : vector<2x64xf32>
    %27 = math.exp %26 : vector<2x64xf32>
    %28 = math.log1p %27 : vector<2x64xf32>
    %29 = arith.addf %23, %28 : vector<2x64xf32>
    %cst_14 = arith.constant 0.693147182 : f32
    %30 = vector.broadcast %cst_14 : f32 to vector<2x64xf32>
    %31 = arith.subf %29, %30 : vector<2x64xf32>
    %c0_15 = arith.constant 0 : index
    %c0_16 = arith.constant 0 : index
    %32 = vector.load %arg12[%c0_15, %c0_16] : memref<320x32xbf16, #tpu.memory_space<vmem>>, vector<64x32xbf16>
    %33 = arith.truncf %31 : vector<2x64xf32> to vector<2x64xbf16>
    %cst_17 = arith.constant dense<0.000000e+00> : vector<2x32xf32>
    %34 = tpu.matmul %33, %32, %cst_17 {dimension_numbers = #tpu.dot_dimension_numbers<[1], [0], [0], [1], [0, 0, 1, 1], [], []>} : vector<2x64xbf16>, vector<64x32xbf16>, vector<2x32xf32> -> vector<2x32xf32>
    %c1 = arith.constant 1 : index
    %c0_18 = arith.constant 0 : index
    %35 = vector.load %arg13[%c1, %c0_18] : memref<24x256xf32, #tpu.memory_space<vmem>>, vector<1x32xf32>
    %36 = vector.broadcast %35 : vector<1x32xf32> to vector<2x32xf32>
    %37 = arith.addf %34, %36 : vector<2x32xf32>
    %c0_19 = arith.constant 0 : index
    %c0_20 = arith.constant 0 : index
    %38 = vector.load %arg7[%c0_19, %c0_20] : memref<2x16xf32, #tpu.memory_space<vmem>>, vector<2x16xf32>
    %c64 = arith.constant 64 : index
    %c0_21 = arith.constant 0 : index
    %39 = vector.load %arg9[%c64, %c0_21] : memref<784x64xbf16, #tpu.memory_space<vmem>>, vector<16x64xbf16>
    %40 = arith.truncf %38 : vector<2x16xf32> to vector<2x16xbf16>
    %cst_22 = arith.constant dense<0.000000e+00> : vector<2x64xf32>
    %41 = tpu.matmul %40, %39, %cst_22 {dimension_numbers = #tpu.dot_dimension_numbers<[1], [0], [0], [1], [0, 0, 1, 1], [], []>} : vector<2x16xbf16>, vector<16x64xbf16>, vector<2x64xf32> -> vector<2x64xf32>
    %c2 = arith.constant 2 : index
    %c0_23 = arith.constant 0 : index
    %42 = vector.load %arg13[%c2, %c0_23] : memref<24x256xf32, #tpu.memory_space<vmem>>, vector<1x64xf32>
    %43 = vector.broadcast %42 : vector<1x64xf32> to vector<2x64xf32>
    %44 = arith.addf %41, %43 : vector<2x64xf32>
    %cst_24 = arith.constant 0.000000e+00 : f32
    %45 = vector.broadcast %cst_24 : f32 to vector<2x64xf32>
    %46 = arith.maximumf %44, %45 : vector<2x64xf32>
    %47 = math.absf %44 : vector<2x64xf32>
    %cst_25 = arith.constant 0.000000e+00 : f32
    %48 = vector.broadcast %cst_25 : f32 to vector<2x64xf32>
    %49 = arith.subf %48, %47 : vector<2x64xf32>
    %50 = math.exp %49 : vector<2x64xf32>
    %51 = math.log1p %50 : vector<2x64xf32>
    %52 = arith.addf %46, %51 : vector<2x64xf32>
    %cst_26 = arith.constant 0.693147182 : f32
    %53 = vector.broadcast %cst_26 : f32 to vector<2x64xf32>
    %54 = arith.subf %52, %53 : vector<2x64xf32>
    %c80 = arith.constant 80 : index
    %c0_27 = arith.constant 0 : index
    %55 = vector.load %arg9[%c80, %c0_27] : memref<784x64xbf16, #tpu.memory_space<vmem>>, vector<64x64xbf16>
    %56 = arith.truncf %54 : vector<2x64xf32> to vector<2x64xbf16>
    %cst_28 = arith.constant dense<0.000000e+00> : vector<2x64xf32>
    %57 = tpu.matmul %56, %55, %cst_28 {dimension_numbers = #tpu.dot_dimension_numbers<[1], [0], [0], [1], [0, 0, 1, 1], [], []>} : vector<2x64xbf16>, vector<64x64xbf16>, vector<2x64xf32> -> vector<2x64xf32>
    %c3 = arith.constant 3 : index
    %c0_29 = arith.constant 0 : index
    %58 = vector.load %arg13[%c3, %c0_29] : memref<24x256xf32, #tpu.memory_space<vmem>>, vector<1x64xf32>
    %59 = vector.broadcast %58 : vector<1x64xf32> to vector<2x64xf32>
    %60 = arith.addf %57, %59 : vector<2x64xf32>
    %c0_30 = arith.constant 0 : index
    %c0_31 = arith.constant 0 : index
    %61 = vector.load %arg1[%c0_30, %c0_31] : memref<32x1xi32, #tpu.memory_space<vmem>>, vector<32x1xi32>
    %62 = tpu.iota {dimensions = array<i32: 1>} : vector<32x16xi32>
    %63 = vector.broadcast %61 : vector<32x1xi32> to vector<32x16xi32>
    %64 = arith.cmpi eq, %63, %62 : vector<32x16xi32>
    %65 = arith.extui %64 : vector<32x16xi1> to vector<32x16xi32>
    %66 = arith.sitofp %65 : vector<32x16xi32> to vector<32x16xf32>
    %c0_32 = arith.constant 0 : index
    %c0_33 = arith.constant 0 : index
    %67 = vector.load %arg2[%c0_32, %c0_33] : memref<1x32xi32, #tpu.memory_space<vmem>>, vector<1x32xi32>
    %68 = tpu.iota {dimensions = array<i32: 0>} : vector<16x32xi32>
    %69 = vector.broadcast %67 : vector<1x32xi32> to vector<16x32xi32>
    %70 = arith.cmpi eq, %69, %68 : vector<16x32xi32>
    %71 = arith.extui %70 : vector<16x32xi1> to vector<16x32xi32>
    %72 = arith.sitofp %71 : vector<16x32xi32> to vector<16x32xf32>
    %c0_34 = arith.constant 0 : index
    %c0_35 = arith.constant 0 : index
    %73 = vector.load %arg3[%c0_34, %c0_35] : memref<1x16xi32, #tpu.memory_space<vmem>>, vector<1x16xi32>
    %74 = tpu.iota {dimensions = array<i32: 0>} : vector<2x16xi32>
    %75 = vector.broadcast %73 : vector<1x16xi32> to vector<2x16xi32>
    %76 = arith.cmpi eq, %75, %74 : vector<2x16xi32>
    %77 = arith.extui %76 : vector<2x16xi1> to vector<2x16xi32>
    %78 = arith.sitofp %77 : vector<2x16xi32> to vector<2x16xf32>
    %cst_36 = arith.constant dense<0.000000e+00> : vector<2xf32>
    %79 = vector.multi_reduction <add>, %78, %cst_36 [1] : vector<2x16xf32> to vector<2xf32>
    %80 = vector.shape_cast %79 : vector<2xf32> to vector<2x1xf32>
    %cst_37 = arith.constant 1.000000e+00 : f32
    %81 = vector.broadcast %cst_37 : f32 to vector<2x1xf32>
    %82 = arith.maximumf %80, %81 : vector<2x1xf32>
    %c0_38 = arith.constant 0 : index
    %c0_39 = arith.constant 0 : index
    %83 = vector.load %arg4[%c0_38, %c0_39] : memref<2x1xi32, #tpu.memory_space<vmem>>, vector<2x1xi32>
    %84 = tpu.iota {dimensions = array<i32: 1>} : vector<2x16xi32>
    %85 = vector.broadcast %83 : vector<2x1xi32> to vector<2x16xi32>
    %86 = arith.cmpi eq, %85, %84 : vector<2x16xi32>
    %87 = arith.extui %86 : vector<2x16xi1> to vector<2x16xi32>
    %88 = arith.sitofp %87 : vector<2x16xi32> to vector<2x16xf32>
    %89 = tpu.iota {dimensions = array<i32: 1>} : vector<32x64xi32>
    %90 = arith.sitofp %89 : vector<32x64xi32> to vector<32x64xf32>
    %cst_40 = arith.constant 1.000000e-01 : f32
    %91 = vector.broadcast %cst_40 : f32 to vector<32x64xf32>
    %92 = arith.mulf %90, %91 : vector<32x64xf32>
    %c0_41 = arith.constant 0 : index
    %c0_42 = arith.constant 0 : index
    %93 = vector.load %arg6[%c0_41, %c0_42] : memref<32x1xf32, #tpu.memory_space<vmem>>, vector<32x1xf32>
    %94 = vector.broadcast %93 : vector<32x1xf32> to vector<32x64xf32>
    %95 = arith.subf %94, %92 : vector<32x64xf32>
    %cst_43 = arith.constant -1.000000e+01 : f32
    %96 = vector.broadcast %cst_43 : f32 to vector<32x64xf32>
    %97 = arith.mulf %96, %95 : vector<32x64xf32>
    %98 = arith.mulf %97, %95 : vector<32x64xf32>
    %99 = math.exp %98 : vector<32x64xf32>
    %c128 = arith.constant 128 : index
    %c0_44 = arith.constant 0 : index
    %100 = vector.load %arg10[%c128, %c0_44] : memref<320x128xbf16, #tpu.memory_space<vmem>>, vector<64x128xbf16>
    %101 = arith.truncf %99 : vector<32x64xf32> to vector<32x64xbf16>
    %cst_45 = arith.constant dense<0.000000e+00> : vector<32x128xf32>
    %102 = tpu.matmul %101, %100, %cst_45 {dimension_numbers = #tpu.dot_dimension_numbers<[1], [0], [0], [1], [0, 0, 1, 1], [], []>} : vector<32x64xbf16>, vector<64x128xbf16>, vector<32x128xf32> -> vector<32x128xf32>
    %c8 = arith.constant 8 : index
    %c0_46 = arith.constant 0 : index
    %103 = vector.load %arg13[%c8, %c0_46] : memref<24x256xf32, #tpu.memory_space<vmem>>, vector<1x128xf32>
    %104 = vector.broadcast %103 : vector<1x128xf32> to vector<32x128xf32>
    %105 = arith.addf %102, %104 : vector<32x128xf32>
    %cst_47 = arith.constant 0.000000e+00 : f32
    %106 = vector.broadcast %cst_47 : f32 to vector<32x128xf32>
    %107 = arith.maximumf %105, %106 : vector<32x128xf32>
    %108 = math.absf %105 : vector<32x128xf32>
    %cst_48 = arith.constant 0.000000e+00 : f32
    %109 = vector.broadcast %cst_48 : f32 to vector<32x128xf32>
    %110 = arith.subf %109, %108 : vector<32x128xf32>
    %111 = math.exp %110 : vector<32x128xf32>
    %112 = math.log1p %111 : vector<32x128xf32>
    %113 = arith.addf %107, %112 : vector<32x128xf32>
    %cst_49 = arith.constant 0.693147182 : f32
    %114 = vector.broadcast %cst_49 : f32 to vector<32x128xf32>
    %115 = arith.subf %113, %114 : vector<32x128xf32>
    %c192 = arith.constant 192 : index
    %c0_50 = arith.constant 0 : index
    %116 = vector.load %arg10[%c192, %c0_50] : memref<320x128xbf16, #tpu.memory_space<vmem>>, vector<128x128xbf16>
    %117 = arith.truncf %115 : vector<32x128xf32> to vector<32x128xbf16>
    %cst_51 = arith.constant dense<0.000000e+00> : vector<32x128xf32>
    %118 = tpu.matmul %117, %116, %cst_51 {dimension_numbers = #tpu.dot_dimension_numbers<[1], [0], [0], [1], [0, 0, 1, 1], [], []>} : vector<32x128xbf16>, vector<128x128xbf16>, vector<32x128xf32> -> vector<32x128xf32>
    %c9 = arith.constant 9 : index
    %c0_52 = arith.constant 0 : index
    %119 = vector.load %arg13[%c9, %c0_52] : memref<24x256xf32, #tpu.memory_space<vmem>>, vector<1x128xf32>
    %120 = vector.broadcast %119 : vector<1x128xf32> to vector<32x128xf32>
    %121 = arith.addf %118, %120 : vector<32x128xf32>
    %c400 = arith.constant 400 : index
    %c0_53 = arith.constant 0 : index
    %122 = vector.load %arg9[%c400, %c0_53] : memref<784x64xbf16, #tpu.memory_space<vmem>>, vector<64x64xbf16>
    %123 = arith.truncf %7 : vector<16x64xf32> to vector<16x64xbf16>
    %cst_54 = arith.constant dense<0.000000e+00> : vector<16x64xf32>
    %124 = tpu.matmul %123, %122, %cst_54 {dimension_numbers = #tpu.dot_dimension_numbers<[1], [0], [0], [1], [0, 0, 1, 1], [], []>} : vector<16x64xbf16>, vector<64x64xbf16>, vector<16x64xf32> -> vector<16x64xf32>
    %c14 = arith.constant 14 : index
    %c0_55 = arith.constant 0 : index
    %125 = vector.load %arg13[%c14, %c0_55] : memref<24x256xf32, #tpu.memory_space<vmem>>, vector<1x64xf32>
    %126 = vector.broadcast %125 : vector<1x64xf32> to vector<16x64xf32>
    %127 = arith.addf %124, %126 : vector<16x64xf32>
    %128 = vector.extract_strided_slice %121 {offsets = [0, 0], sizes = [32, 64], strides = [1, 1]} : vector<32x128xf32> to vector<32x64xf32>
    %129 = arith.truncf %66 : vector<32x16xf32> to vector<32x16xbf16>
    %130 = arith.truncf %127 : vector<16x64xf32> to vector<16x64xbf16>
    %cst_56 = arith.constant dense<0.000000e+00> : vector<32x64xf32>
    %131 = tpu.matmul %129, %130, %cst_56 {dimension_numbers = #tpu.dot_dimension_numbers<[1], [0], [0], [1], [0, 0, 1, 1], [], []>} : vector<32x16xbf16>, vector<16x64xbf16>, vector<32x64xf32> -> vector<32x64xf32>
    %132 = arith.mulf %131, %128 : vector<32x64xf32>
    %133 = arith.truncf %72 : vector<16x32xf32> to vector<16x32xbf16>
    %134 = arith.truncf %132 : vector<32x64xf32> to vector<32x64xbf16>
    %cst_57 = arith.constant dense<0.000000e+00> : vector<16x64xf32>
    %135 = tpu.matmul %133, %134, %cst_57 {dimension_numbers = #tpu.dot_dimension_numbers<[1], [0], [0], [1], [0, 0, 1, 1], [], []>} : vector<16x32xbf16>, vector<32x64xbf16>, vector<16x64xf32> -> vector<16x64xf32>
    %c464 = arith.constant 464 : index
    %c0_58 = arith.constant 0 : index
    %136 = vector.load %arg9[%c464, %c0_58] : memref<784x64xbf16, #tpu.memory_space<vmem>>, vector<64x64xbf16>
    %137 = arith.truncf %135 : vector<16x64xf32> to vector<16x64xbf16>
    %cst_59 = arith.constant dense<0.000000e+00> : vector<16x64xf32>
    %138 = tpu.matmul %137, %136, %cst_59 {dimension_numbers = #tpu.dot_dimension_numbers<[1], [0], [0], [1], [0, 0, 1, 1], [], []>} : vector<16x64xbf16>, vector<64x64xbf16>, vector<16x64xf32> -> vector<16x64xf32>
    %c15 = arith.constant 15 : index
    %c0_60 = arith.constant 0 : index
    %139 = vector.load %arg13[%c15, %c0_60] : memref<24x256xf32, #tpu.memory_space<vmem>>, vector<1x64xf32>
    %140 = vector.broadcast %139 : vector<1x64xf32> to vector<16x64xf32>
    %141 = arith.addf %138, %140 : vector<16x64xf32>
    %cst_61 = arith.constant 0.000000e+00 : f32
    %142 = vector.broadcast %cst_61 : f32 to vector<16x64xf32>
    %143 = arith.maximumf %141, %142 : vector<16x64xf32>
    %144 = math.absf %141 : vector<16x64xf32>
    %cst_62 = arith.constant 0.000000e+00 : f32
    %145 = vector.broadcast %cst_62 : f32 to vector<16x64xf32>
    %146 = arith.subf %145, %144 : vector<16x64xf32>
    %147 = math.exp %146 : vector<16x64xf32>
    %148 = math.log1p %147 : vector<16x64xf32>
    %149 = arith.addf %143, %148 : vector<16x64xf32>
    %cst_63 = arith.constant 0.693147182 : f32
    %150 = vector.broadcast %cst_63 : f32 to vector<16x64xf32>
    %151 = arith.subf %149, %150 : vector<16x64xf32>
    %c528 = arith.constant 528 : index
    %c0_64 = arith.constant 0 : index
    %152 = vector.load %arg9[%c528, %c0_64] : memref<784x64xbf16, #tpu.memory_space<vmem>>, vector<64x64xbf16>
    %153 = arith.truncf %151 : vector<16x64xf32> to vector<16x64xbf16>
    %cst_65 = arith.constant dense<0.000000e+00> : vector<16x64xf32>
    %154 = tpu.matmul %153, %152, %cst_65 {dimension_numbers = #tpu.dot_dimension_numbers<[1], [0], [0], [1], [0, 0, 1, 1], [], []>} : vector<16x64xbf16>, vector<64x64xbf16>, vector<16x64xf32> -> vector<16x64xf32>
    %c16 = arith.constant 16 : index
    %c0_66 = arith.constant 0 : index
    %155 = vector.load %arg13[%c16, %c0_66] : memref<24x256xf32, #tpu.memory_space<vmem>>, vector<1x64xf32>
    %156 = vector.broadcast %155 : vector<1x64xf32> to vector<16x64xf32>
    %157 = arith.addf %154, %156 : vector<16x64xf32>
    %158 = arith.addf %7, %157 : vector<16x64xf32>
    %159 = arith.truncf %78 : vector<2x16xf32> to vector<2x16xbf16>
    %160 = arith.truncf %158 : vector<16x64xf32> to vector<16x64xbf16>
    %cst_67 = arith.constant dense<0.000000e+00> : vector<2x64xf32>
    %161 = tpu.matmul %159, %160, %cst_67 {dimension_numbers = #tpu.dot_dimension_numbers<[1], [0], [0], [1], [0, 0, 1, 1], [], []>} : vector<2x16xbf16>, vector<16x64xbf16>, vector<2x64xf32> -> vector<2x64xf32>
    %162 = vector.broadcast %82 : vector<2x1xf32> to vector<2x64xf32>
    %163 = arith.divf %161, %162 : vector<2x64xf32>
    %164 = tpu.concatenate %163, %60 in 1 : vector<2x64xf32>, vector<2x64xf32> -> vector<2x128xf32>
    %c0_68 = arith.constant 0 : index
    %c0_69 = arith.constant 0 : index
    %165 = vector.load %arg10[%c0_68, %c0_69] : memref<320x128xbf16, #tpu.memory_space<vmem>>, vector<128x128xbf16>
    %166 = arith.truncf %164 : vector<2x128xf32> to vector<2x128xbf16>
    %cst_70 = arith.constant dense<0.000000e+00> : vector<2x128xf32>
    %167 = tpu.matmul %166, %165, %cst_70 {dimension_numbers = #tpu.dot_dimension_numbers<[1], [0], [0], [1], [0, 0, 1, 1], [], []>} : vector<2x128xbf16>, vector<128x128xbf16>, vector<2x128xf32> -> vector<2x128xf32>
    %c4 = arith.constant 4 : index
    %c0_71 = arith.constant 0 : index
    %168 = vector.load %arg13[%c4, %c0_71] : memref<24x256xf32, #tpu.memory_space<vmem>>, vector<1x128xf32>
    %169 = vector.broadcast %168 : vector<1x128xf32> to vector<2x128xf32>
    %170 = arith.addf %167, %169 : vector<2x128xf32>
    %cst_72 = arith.constant 0.000000e+00 : f32
    %171 = vector.broadcast %cst_72 : f32 to vector<2x128xf32>
    %172 = arith.maximumf %170, %171 : vector<2x128xf32>
    %173 = math.absf %170 : vector<2x128xf32>
    %cst_73 = arith.constant 0.000000e+00 : f32
    %174 = vector.broadcast %cst_73 : f32 to vector<2x128xf32>
    %175 = arith.subf %174, %173 : vector<2x128xf32>
    %176 = math.exp %175 : vector<2x128xf32>
    %177 = math.log1p %176 : vector<2x128xf32>
    %178 = arith.addf %172, %177 : vector<2x128xf32>
    %cst_74 = arith.constant 0.693147182 : f32
    %179 = vector.broadcast %cst_74 : f32 to vector<2x128xf32>
    %180 = arith.subf %178, %179 : vector<2x128xf32>
    %c144 = arith.constant 144 : index
    %c0_75 = arith.constant 0 : index
    %181 = vector.load %arg9[%c144, %c0_75] : memref<784x64xbf16, #tpu.memory_space<vmem>>, vector<128x64xbf16>
    %182 = arith.truncf %180 : vector<2x128xf32> to vector<2x128xbf16>
    %cst_76 = arith.constant dense<0.000000e+00> : vector<2x64xf32>
    %183 = tpu.matmul %182, %181, %cst_76 {dimension_numbers = #tpu.dot_dimension_numbers<[1], [0], [0], [1], [0, 0, 1, 1], [], []>} : vector<2x128xbf16>, vector<128x64xbf16>, vector<2x64xf32> -> vector<2x64xf32>
    %c5 = arith.constant 5 : index
    %c0_77 = arith.constant 0 : index
    %184 = vector.load %arg13[%c5, %c0_77] : memref<24x256xf32, #tpu.memory_space<vmem>>, vector<1x64xf32>
    %185 = vector.broadcast %184 : vector<1x64xf32> to vector<2x64xf32>
    %186 = arith.addf %183, %185 : vector<2x64xf32>
    %c272 = arith.constant 272 : index
    %c0_78 = arith.constant 0 : index
    %187 = vector.load %arg9[%c272, %c0_78] : memref<784x64xbf16, #tpu.memory_space<vmem>>, vector<64x64xbf16>
    %188 = arith.truncf %186 : vector<2x64xf32> to vector<2x64xbf16>
    %cst_79 = arith.constant dense<0.000000e+00> : vector<2x64xf32>
    %189 = tpu.matmul %188, %187, %cst_79 {dimension_numbers = #tpu.dot_dimension_numbers<[1], [0], [0], [1], [0, 0, 1, 1], [], []>} : vector<2x64xbf16>, vector<64x64xbf16>, vector<2x64xf32> -> vector<2x64xf32>
    %c6 = arith.constant 6 : index
    %c0_80 = arith.constant 0 : index
    %190 = vector.load %arg13[%c6, %c0_80] : memref<24x256xf32, #tpu.memory_space<vmem>>, vector<1x64xf32>
    %191 = vector.broadcast %190 : vector<1x64xf32> to vector<2x64xf32>
    %192 = arith.addf %189, %191 : vector<2x64xf32>
    %cst_81 = arith.constant 0.000000e+00 : f32
    %193 = vector.broadcast %cst_81 : f32 to vector<2x64xf32>
    %194 = arith.maximumf %192, %193 : vector<2x64xf32>
    %195 = math.absf %192 : vector<2x64xf32>
    %cst_82 = arith.constant 0.000000e+00 : f32
    %196 = vector.broadcast %cst_82 : f32 to vector<2x64xf32>
    %197 = arith.subf %196, %195 : vector<2x64xf32>
    %198 = math.exp %197 : vector<2x64xf32>
    %199 = math.log1p %198 : vector<2x64xf32>
    %200 = arith.addf %194, %199 : vector<2x64xf32>
    %cst_83 = arith.constant 0.693147182 : f32
    %201 = vector.broadcast %cst_83 : f32 to vector<2x64xf32>
    %202 = arith.subf %200, %201 : vector<2x64xf32>
    %c336 = arith.constant 336 : index
    %c0_84 = arith.constant 0 : index
    %203 = vector.load %arg9[%c336, %c0_84] : memref<784x64xbf16, #tpu.memory_space<vmem>>, vector<64x64xbf16>
    %204 = arith.truncf %202 : vector<2x64xf32> to vector<2x64xbf16>
    %cst_85 = arith.constant dense<0.000000e+00> : vector<2x64xf32>
    %205 = tpu.matmul %204, %203, %cst_85 {dimension_numbers = #tpu.dot_dimension_numbers<[1], [0], [0], [1], [0, 0, 1, 1], [], []>} : vector<2x64xbf16>, vector<64x64xbf16>, vector<2x64xf32> -> vector<2x64xf32>
    %c7 = arith.constant 7 : index
    %c0_86 = arith.constant 0 : index
    %206 = vector.load %arg13[%c7, %c0_86] : memref<24x256xf32, #tpu.memory_space<vmem>>, vector<1x64xf32>
    %207 = vector.broadcast %206 : vector<1x64xf32> to vector<2x64xf32>
    %208 = arith.addf %205, %207 : vector<2x64xf32>
    %209 = arith.addf %60, %208 : vector<2x64xf32>
    %c592 = arith.constant 592 : index
    %c0_87 = arith.constant 0 : index
    %210 = vector.load %arg9[%c592, %c0_87] : memref<784x64xbf16, #tpu.memory_space<vmem>>, vector<64x64xbf16>
    %211 = arith.truncf %158 : vector<16x64xf32> to vector<16x64xbf16>
    %cst_88 = arith.constant dense<0.000000e+00> : vector<16x64xf32>
    %212 = tpu.matmul %211, %210, %cst_88 {dimension_numbers = #tpu.dot_dimension_numbers<[1], [0], [0], [1], [0, 0, 1, 1], [], []>} : vector<16x64xbf16>, vector<64x64xbf16>, vector<16x64xf32> -> vector<16x64xf32>
    %c17 = arith.constant 17 : index
    %c0_89 = arith.constant 0 : index
    %213 = vector.load %arg13[%c17, %c0_89] : memref<24x256xf32, #tpu.memory_space<vmem>>, vector<1x64xf32>
    %214 = vector.broadcast %213 : vector<1x64xf32> to vector<16x64xf32>
    %215 = arith.addf %212, %214 : vector<16x64xf32>
    %216 = vector.extract_strided_slice %121 {offsets = [0, 64], sizes = [32, 64], strides = [1, 1]} : vector<32x128xf32> to vector<32x64xf32>
    %217 = arith.truncf %66 : vector<32x16xf32> to vector<32x16xbf16>
    %218 = arith.truncf %215 : vector<16x64xf32> to vector<16x64xbf16>
    %cst_90 = arith.constant dense<0.000000e+00> : vector<32x64xf32>
    %219 = tpu.matmul %217, %218, %cst_90 {dimension_numbers = #tpu.dot_dimension_numbers<[1], [0], [0], [1], [0, 0, 1, 1], [], []>} : vector<32x16xbf16>, vector<16x64xbf16>, vector<32x64xf32> -> vector<32x64xf32>
    %220 = arith.mulf %219, %216 : vector<32x64xf32>
    %221 = arith.truncf %72 : vector<16x32xf32> to vector<16x32xbf16>
    %222 = arith.truncf %220 : vector<32x64xf32> to vector<32x64xbf16>
    %cst_91 = arith.constant dense<0.000000e+00> : vector<16x64xf32>
    %223 = tpu.matmul %221, %222, %cst_91 {dimension_numbers = #tpu.dot_dimension_numbers<[1], [0], [0], [1], [0, 0, 1, 1], [], []>} : vector<16x32xbf16>, vector<32x64xbf16>, vector<16x64xf32> -> vector<16x64xf32>
    %c656 = arith.constant 656 : index
    %c0_92 = arith.constant 0 : index
    %224 = vector.load %arg9[%c656, %c0_92] : memref<784x64xbf16, #tpu.memory_space<vmem>>, vector<64x64xbf16>
    %225 = arith.truncf %223 : vector<16x64xf32> to vector<16x64xbf16>
    %cst_93 = arith.constant dense<0.000000e+00> : vector<16x64xf32>
    %226 = tpu.matmul %225, %224, %cst_93 {dimension_numbers = #tpu.dot_dimension_numbers<[1], [0], [0], [1], [0, 0, 1, 1], [], []>} : vector<16x64xbf16>, vector<64x64xbf16>, vector<16x64xf32> -> vector<16x64xf32>
    %c18 = arith.constant 18 : index
    %c0_94 = arith.constant 0 : index
    %227 = vector.load %arg13[%c18, %c0_94] : memref<24x256xf32, #tpu.memory_space<vmem>>, vector<1x64xf32>
    %228 = vector.broadcast %227 : vector<1x64xf32> to vector<16x64xf32>
    %229 = arith.addf %226, %228 : vector<16x64xf32>
    %cst_95 = arith.constant 0.000000e+00 : f32
    %230 = vector.broadcast %cst_95 : f32 to vector<16x64xf32>
    %231 = arith.maximumf %229, %230 : vector<16x64xf32>
    %232 = math.absf %229 : vector<16x64xf32>
    %cst_96 = arith.constant 0.000000e+00 : f32
    %233 = vector.broadcast %cst_96 : f32 to vector<16x64xf32>
    %234 = arith.subf %233, %232 : vector<16x64xf32>
    %235 = math.exp %234 : vector<16x64xf32>
    %236 = math.log1p %235 : vector<16x64xf32>
    %237 = arith.addf %231, %236 : vector<16x64xf32>
    %cst_97 = arith.constant 0.693147182 : f32
    %238 = vector.broadcast %cst_97 : f32 to vector<16x64xf32>
    %239 = arith.subf %237, %238 : vector<16x64xf32>
    %c720 = arith.constant 720 : index
    %c0_98 = arith.constant 0 : index
    %240 = vector.load %arg9[%c720, %c0_98] : memref<784x64xbf16, #tpu.memory_space<vmem>>, vector<64x64xbf16>
    %241 = arith.truncf %239 : vector<16x64xf32> to vector<16x64xbf16>
    %cst_99 = arith.constant dense<0.000000e+00> : vector<16x64xf32>
    %242 = tpu.matmul %241, %240, %cst_99 {dimension_numbers = #tpu.dot_dimension_numbers<[1], [0], [0], [1], [0, 0, 1, 1], [], []>} : vector<16x64xbf16>, vector<64x64xbf16>, vector<16x64xf32> -> vector<16x64xf32>
    %c19 = arith.constant 19 : index
    %c0_100 = arith.constant 0 : index
    %243 = vector.load %arg13[%c19, %c0_100] : memref<24x256xf32, #tpu.memory_space<vmem>>, vector<1x64xf32>
    %244 = vector.broadcast %243 : vector<1x64xf32> to vector<16x64xf32>
    %245 = arith.addf %242, %244 : vector<16x64xf32>
    %246 = arith.addf %158, %245 : vector<16x64xf32>
    %247 = arith.truncf %78 : vector<2x16xf32> to vector<2x16xbf16>
    %248 = arith.truncf %246 : vector<16x64xf32> to vector<16x64xbf16>
    %cst_101 = arith.constant dense<0.000000e+00> : vector<2x64xf32>
    %249 = tpu.matmul %247, %248, %cst_101 {dimension_numbers = #tpu.dot_dimension_numbers<[1], [0], [0], [1], [0, 0, 1, 1], [], []>} : vector<2x16xbf16>, vector<16x64xbf16>, vector<2x64xf32> -> vector<2x64xf32>
    %250 = vector.broadcast %82 : vector<2x1xf32> to vector<2x64xf32>
    %251 = arith.divf %249, %250 : vector<2x64xf32>
    %252 = tpu.concatenate %251, %209 in 1 : vector<2x64xf32>, vector<2x64xf32> -> vector<2x128xf32>
    %c0_102 = arith.constant 0 : index
    %c0_103 = arith.constant 0 : index
    %253 = vector.load %arg10[%c0_102, %c0_103] : memref<320x128xbf16, #tpu.memory_space<vmem>>, vector<128x128xbf16>
    %254 = arith.truncf %252 : vector<2x128xf32> to vector<2x128xbf16>
    %cst_104 = arith.constant dense<0.000000e+00> : vector<2x128xf32>
    %255 = tpu.matmul %254, %253, %cst_104 {dimension_numbers = #tpu.dot_dimension_numbers<[1], [0], [0], [1], [0, 0, 1, 1], [], []>} : vector<2x128xbf16>, vector<128x128xbf16>, vector<2x128xf32> -> vector<2x128xf32>
    %c4_105 = arith.constant 4 : index
    %c0_106 = arith.constant 0 : index
    %256 = vector.load %arg13[%c4_105, %c0_106] : memref<24x256xf32, #tpu.memory_space<vmem>>, vector<1x128xf32>
    %257 = vector.broadcast %256 : vector<1x128xf32> to vector<2x128xf32>
    %258 = arith.addf %255, %257 : vector<2x128xf32>
    %cst_107 = arith.constant 0.000000e+00 : f32
    %259 = vector.broadcast %cst_107 : f32 to vector<2x128xf32>
    %260 = arith.maximumf %258, %259 : vector<2x128xf32>
    %261 = math.absf %258 : vector<2x128xf32>
    %cst_108 = arith.constant 0.000000e+00 : f32
    %262 = vector.broadcast %cst_108 : f32 to vector<2x128xf32>
    %263 = arith.subf %262, %261 : vector<2x128xf32>
    %264 = math.exp %263 : vector<2x128xf32>
    %265 = math.log1p %264 : vector<2x128xf32>
    %266 = arith.addf %260, %265 : vector<2x128xf32>
    %cst_109 = arith.constant 0.693147182 : f32
    %267 = vector.broadcast %cst_109 : f32 to vector<2x128xf32>
    %268 = arith.subf %266, %267 : vector<2x128xf32>
    %c144_110 = arith.constant 144 : index
    %c0_111 = arith.constant 0 : index
    %269 = vector.load %arg9[%c144_110, %c0_111] : memref<784x64xbf16, #tpu.memory_space<vmem>>, vector<128x64xbf16>
    %270 = arith.truncf %268 : vector<2x128xf32> to vector<2x128xbf16>
    %cst_112 = arith.constant dense<0.000000e+00> : vector<2x64xf32>
    %271 = tpu.matmul %270, %269, %cst_112 {dimension_numbers = #tpu.dot_dimension_numbers<[1], [0], [0], [1], [0, 0, 1, 1], [], []>} : vector<2x128xbf16>, vector<128x64xbf16>, vector<2x64xf32> -> vector<2x64xf32>
    %c5_113 = arith.constant 5 : index
    %c0_114 = arith.constant 0 : index
    %272 = vector.load %arg13[%c5_113, %c0_114] : memref<24x256xf32, #tpu.memory_space<vmem>>, vector<1x64xf32>
    %273 = vector.broadcast %272 : vector<1x64xf32> to vector<2x64xf32>
    %274 = arith.addf %271, %273 : vector<2x64xf32>
    %c272_115 = arith.constant 272 : index
    %c0_116 = arith.constant 0 : index
    %275 = vector.load %arg9[%c272_115, %c0_116] : memref<784x64xbf16, #tpu.memory_space<vmem>>, vector<64x64xbf16>
    %276 = arith.truncf %274 : vector<2x64xf32> to vector<2x64xbf16>
    %cst_117 = arith.constant dense<0.000000e+00> : vector<2x64xf32>
    %277 = tpu.matmul %276, %275, %cst_117 {dimension_numbers = #tpu.dot_dimension_numbers<[1], [0], [0], [1], [0, 0, 1, 1], [], []>} : vector<2x64xbf16>, vector<64x64xbf16>, vector<2x64xf32> -> vector<2x64xf32>
    %c6_118 = arith.constant 6 : index
    %c0_119 = arith.constant 0 : index
    %278 = vector.load %arg13[%c6_118, %c0_119] : memref<24x256xf32, #tpu.memory_space<vmem>>, vector<1x64xf32>
    %279 = vector.broadcast %278 : vector<1x64xf32> to vector<2x64xf32>
    %280 = arith.addf %277, %279 : vector<2x64xf32>
    %cst_120 = arith.constant 0.000000e+00 : f32
    %281 = vector.broadcast %cst_120 : f32 to vector<2x64xf32>
    %282 = arith.maximumf %280, %281 : vector<2x64xf32>
    %283 = math.absf %280 : vector<2x64xf32>
    %cst_121 = arith.constant 0.000000e+00 : f32
    %284 = vector.broadcast %cst_121 : f32 to vector<2x64xf32>
    %285 = arith.subf %284, %283 : vector<2x64xf32>
    %286 = math.exp %285 : vector<2x64xf32>
    %287 = math.log1p %286 : vector<2x64xf32>
    %288 = arith.addf %282, %287 : vector<2x64xf32>
    %cst_122 = arith.constant 0.693147182 : f32
    %289 = vector.broadcast %cst_122 : f32 to vector<2x64xf32>
    %290 = arith.subf %288, %289 : vector<2x64xf32>
    %c336_123 = arith.constant 336 : index
    %c0_124 = arith.constant 0 : index
    %291 = vector.load %arg9[%c336_123, %c0_124] : memref<784x64xbf16, #tpu.memory_space<vmem>>, vector<64x64xbf16>
    %292 = arith.truncf %290 : vector<2x64xf32> to vector<2x64xbf16>
    %cst_125 = arith.constant dense<0.000000e+00> : vector<2x64xf32>
    %293 = tpu.matmul %292, %291, %cst_125 {dimension_numbers = #tpu.dot_dimension_numbers<[1], [0], [0], [1], [0, 0, 1, 1], [], []>} : vector<2x64xbf16>, vector<64x64xbf16>, vector<2x64xf32> -> vector<2x64xf32>
    %c7_126 = arith.constant 7 : index
    %c0_127 = arith.constant 0 : index
    %294 = vector.load %arg13[%c7_126, %c0_127] : memref<24x256xf32, #tpu.memory_space<vmem>>, vector<1x64xf32>
    %295 = vector.broadcast %294 : vector<1x64xf32> to vector<2x64xf32>
    %296 = arith.addf %293, %295 : vector<2x64xf32>
    %297 = arith.addf %209, %296 : vector<2x64xf32>
    %298 = arith.truncf %88 : vector<2x16xf32> to vector<2x16xbf16>
    %299 = arith.truncf %246 : vector<16x64xf32> to vector<16x64xbf16>
    %cst_128 = arith.constant dense<0.000000e+00> : vector<2x64xf32>
    %300 = tpu.matmul %298, %299, %cst_128 {dimension_numbers = #tpu.dot_dimension_numbers<[1], [0], [0], [1], [0, 0, 1, 1], [], []>} : vector<2x16xbf16>, vector<16x64xbf16>, vector<2x64xf32> -> vector<2x64xf32>
    %c0_129 = arith.constant 0 : index
    %c0_130 = arith.constant 0 : index
    %301 = vector.load %arg11[%c0_129, %c0_130] : memref<160x256xbf16, #tpu.memory_space<vmem>>, vector<64x256xbf16>
    %302 = arith.truncf %300 : vector<2x64xf32> to vector<2x64xbf16>
    %cst_131 = arith.constant dense<0.000000e+00> : vector<2x256xf32>
    %303 = tpu.matmul %302, %301, %cst_131 {dimension_numbers = #tpu.dot_dimension_numbers<[1], [0], [0], [1], [0, 0, 1, 1], [], []>} : vector<2x64xbf16>, vector<64x256xbf16>, vector<2x256xf32> -> vector<2x256xf32>
    %c10 = arith.constant 10 : index
    %c0_132 = arith.constant 0 : index
    %304 = vector.load %arg13[%c10, %c0_132] : memref<24x256xf32, #tpu.memory_space<vmem>>, vector<1x256xf32>
    %305 = vector.broadcast %304 : vector<1x256xf32> to vector<2x256xf32>
    %306 = arith.addf %303, %305 : vector<2x256xf32>
    %c64_133 = arith.constant 64 : index
    %c0_134 = arith.constant 0 : index
    %307 = vector.load %arg11[%c64_133, %c0_134] : memref<160x256xbf16, #tpu.memory_space<vmem>>, vector<64x256xbf16>
    %308 = arith.truncf %297 : vector<2x64xf32> to vector<2x64xbf16>
    %cst_135 = arith.constant dense<0.000000e+00> : vector<2x256xf32>
    %309 = tpu.matmul %308, %307, %cst_135 {dimension_numbers = #tpu.dot_dimension_numbers<[1], [0], [0], [1], [0, 0, 1, 1], [], []>} : vector<2x64xbf16>, vector<64x256xbf16>, vector<2x256xf32> -> vector<2x256xf32>
    %310 = arith.addf %306, %309 : vector<2x256xf32>
    %c128_136 = arith.constant 128 : index
    %c0_137 = arith.constant 0 : index
    %311 = vector.load %arg11[%c128_136, %c0_137] : memref<160x256xbf16, #tpu.memory_space<vmem>>, vector<32x256xbf16>
    %312 = arith.truncf %37 : vector<2x32xf32> to vector<2x32xbf16>
    %cst_138 = arith.constant dense<0.000000e+00> : vector<2x256xf32>
    %313 = tpu.matmul %312, %311, %cst_138 {dimension_numbers = #tpu.dot_dimension_numbers<[1], [0], [0], [1], [0, 0, 1, 1], [], []>} : vector<2x32xbf16>, vector<32x256xbf16>, vector<2x256xf32> -> vector<2x256xf32>
    %314 = arith.addf %310, %313 : vector<2x256xf32>
    %cst_139 = arith.constant 0.000000e+00 : f32
    %315 = vector.broadcast %cst_139 : f32 to vector<2x256xf32>
    %316 = arith.maximumf %314, %315 : vector<2x256xf32>
    %317 = math.absf %314 : vector<2x256xf32>
    %cst_140 = arith.constant 0.000000e+00 : f32
    %318 = vector.broadcast %cst_140 : f32 to vector<2x256xf32>
    %319 = arith.subf %318, %317 : vector<2x256xf32>
    %320 = math.exp %319 : vector<2x256xf32>
    %321 = math.log1p %320 : vector<2x256xf32>
    %322 = arith.addf %316, %321 : vector<2x256xf32>
    %cst_141 = arith.constant 0.693147182 : f32
    %323 = vector.broadcast %cst_141 : f32 to vector<2x256xf32>
    %324 = arith.subf %322, %323 : vector<2x256xf32>
    %c64_142 = arith.constant 64 : index
    %c0_143 = arith.constant 0 : index
    %325 = vector.load %arg12[%c64_142, %c0_143] : memref<320x32xbf16, #tpu.memory_space<vmem>>, vector<256x32xbf16>
    %326 = arith.truncf %324 : vector<2x256xf32> to vector<2x256xbf16>
    %cst_144 = arith.constant dense<0.000000e+00> : vector<2x32xf32>
    %327 = tpu.matmul %326, %325, %cst_144 {dimension_numbers = #tpu.dot_dimension_numbers<[1], [0], [0], [1], [0, 0, 1, 1], [], []>} : vector<2x256xbf16>, vector<256x32xbf16>, vector<2x32xf32> -> vector<2x32xf32>
    %c11 = arith.constant 11 : index
    %c0_145 = arith.constant 0 : index
    %328 = vector.load %arg13[%c11, %c0_145] : memref<24x256xf32, #tpu.memory_space<vmem>>, vector<1x32xf32>
    %329 = vector.broadcast %328 : vector<1x32xf32> to vector<2x32xf32>
    %330 = arith.addf %327, %329 : vector<2x32xf32>
    %cst_146 = arith.constant 0.000000e+00 : f32
    %331 = vector.broadcast %cst_146 : f32 to vector<2x32xf32>
    %332 = arith.maximumf %330, %331 : vector<2x32xf32>
    %333 = math.absf %330 : vector<2x32xf32>
    %cst_147 = arith.constant 0.000000e+00 : f32
    %334 = vector.broadcast %cst_147 : f32 to vector<2x32xf32>
    %335 = arith.subf %334, %333 : vector<2x32xf32>
    %336 = math.exp %335 : vector<2x32xf32>
    %337 = math.log1p %336 : vector<2x32xf32>
    %338 = arith.addf %332, %337 : vector<2x32xf32>
    %cst_148 = arith.constant 0.693147182 : f32
    %339 = vector.broadcast %cst_148 : f32 to vector<2x32xf32>
    %340 = arith.subf %338, %339 : vector<2x32xf32>
    %c13 = arith.constant 13 : index
    %c0_149 = arith.constant 0 : index
    %341 = vector.load %arg13[%c13, %c0_149] : memref<24x256xf32, #tpu.memory_space<vmem>>, vector<1x32xf32>
    %342 = vector.broadcast %341 : vector<1x32xf32> to vector<2x32xf32>
    %343 = arith.mulf %340, %342 : vector<2x32xf32>
    %cst_150 = arith.constant dense<0.000000e+00> : vector<2xf32>
    %344 = vector.multi_reduction <add>, %343, %cst_150 [1] : vector<2x32xf32> to vector<2xf32>
    %345 = vector.shape_cast %344 : vector<2xf32> to vector<2x1xf32>
    %c12 = arith.constant 12 : index
    %c0_151 = arith.constant 0 : index
    %346 = vector.load %arg13[%c12, %c0_151] : memref<24x256xf32, #tpu.memory_space<vmem>>, vector<1x1xf32>
    %347 = vector.broadcast %346 : vector<1x1xf32> to vector<2x1xf32>
    %348 = arith.addf %345, %347 : vector<2x1xf32>
    %c0_152 = arith.constant 0 : index
    %c0_153 = arith.constant 0 : index
    %349 = vector.load %arg14[%c0_152, %c0_153] : memref<2x1xf32, #tpu.memory_space<vmem>>, vector<2x1xf32>
    tpu.vector_store %arg14[%c0_152, %c0_153], %348 {strides = array<i32>} : memref<2x1xf32, #tpu.memory_space<vmem>>, vector<2x1xf32>,
    return
  }
}

</mosaic_0001>

<bundles_post_ra>
// kernel: zschnet_cdft_forward.1
= control target key start
LH: loop header
LB: loop body
LE: loop exit
PB: predicated region body
PF: predicated region fallthrough
CT: control target
= control target key end

     0   :  { %v3859_v0 = vmov 0   ;;  %vm84_vm0 = vcmask 1043456   ;;  %v3860_v5 = vmov 0.0   ;;  %vm3861_vm1 = vmmov 0   ;;  %s4824_s5 = inlined_call_operand.vmem [shape: s32[2,1], index: 5, kind: input, shape index: {}]   ;;  %s4825_s0 = inlined_call_operand.vmem [shape: s32[16,1], index: 0, kind: input, shape index: {}]   ;;  %s4826_s6 = inlined_call_operand.vmem [shape: f32[32,1], index: 6, kind: input, shape index: {}]   ;;  %s4827_s8 = inlined_call_operand.vmem [shape: f32[112,64], index: 8, kind: input, shape index: {}]   ;;  %s4828_s1 = inlined_call_operand.vmem [shape: s32[32,1], index: 1, kind: input, shape index: {}]   ;;  %s4829_s9 = inlined_call_operand.vmem [shape: bf16[784,64], index: 9, kind: input, shape index: {}]   ;;  %s4830_s7 = inlined_call_operand.vmem [shape: f32[2,16], index: 7, kind: input, shape index: {}]   ;;  %s4831_s12 = inlined_call_operand.vmem [shape: bf16[320,32], index: 12, kind: input, shape index: {}]   ;;  %s4832_s10 = inlined_call_operand.vmem [shape: bf16[320,128], index: 10, kind: input, shape index: {}]   ;;  %s4833_s13 = inlined_call_operand.vmem [shape: f32[24,256], index: 13, kind: input, shape index: {}]   ;;  %s4834_s2 = inlined_call_operand.vmem [shape: s32[1,32], index: 2, kind: input, shape index: {}]   ;;  %s4835_s3 = inlined_call_operand.vmem [shape: s32[1,16], index: 3, kind: input, shape index: {}]   ;;  %s4836_s4 = inlined_call_operand.vmem [shape: s32[2,1], index: 4, kind: input, shape index: {}]   ;;  %s4837_s11 = inlined_call_operand.vmem [shape: bf16[160,256], index: 11, kind: input, shape index: {}]   ;;  %s4838_s14 = inlined_call_operand.vmem [shape: f32[2,1], index: 14, kind: output, shape index: {}]  }
   0x1   :  { %3660 = vset.pattern.permute.xlu0 %v3859_v0  ;;  %v163_v1 = vld [vmem:[%s4824_s5] sm:$0x3]  ;;  %3661 = vset.pattern.permute.xlu1 %v3859_v0  ;;  %v49_v2 = vld [vmem:[%s4825_s0 + $0x8] sm:$0xff]  ;;  %v619_v8 = vld [vmem:[%s4826_s6 + $0x10] sm:$0xff]  ;;  %v50_v27 = vlaneseq  ;;  %vm171_vm2 = vcmask 31744   ;;  %vm77_vm5 = vcmask 818176  }
   0x2   :  { %165 = vperm.xlu0 %3660, %v163_v1   ;;  %56 = vperm.xlu1 %3661, %v49_v2   ;;  %v48_v3 = vld [vmem:[%s4825_s0] sm:$0xff]  ;;  %v170_v6 = vld [vmem:[%s4827_s8 + $0x68] sm:$0xf]  ;;  %v620_v9 = vld [vmem:[%s4826_s6 + $0x18] sm:$0xff]  ;;  %vm430_vm7 = vcmask 130048   ;;  %vm282_vm8 = vcmask 523264  }
   0x3   :  { %v617_v4 = vld [vmem:[%s4826_s6] sm:$0xff]  ;;  %3331 = vmatprep.subr.mxu1 %v3860_v5  ;;  %3333 = vmatprep.mubr.msk.f32.mxu1 %vm3861_vm1, %v3860_v5  ;;  %v618_v7 = vld [vmem:[%s4826_s6 + $0x8] sm:$0xff]  ;;  %v569_v12 = vld [vmem:[%s4828_s1 + $0x10] sm:$0xff]  ;;  %v4024_v28 = vand.u32 127, %v50_v27 }
   0x4   :  { %3332 = vmatpush3.msk.msra.mxu1 %vm84_vm0, %v170_v6  ;;  %v567_v10 = vld [vmem:[%s4828_s1] sm:$0xff]  ;;  %v568_v11 = vld [vmem:[%s4828_s1 + $0x8] sm:$0xff]  ;;  %v570_v13 = vld [vmem:[%s4828_s1 + $0x18] sm:$0xff]  ;;  %s3862_s1 = smov 64  }
   0x5   :  { %3336 = vmatprep.subr.bf16.mxu1 %v3860_v5  ;;  %v76_v14 = vld [vmem:[%s4827_s8 + $0x60] sm:$0xf]  ;;  %v75_v15 = vld [vmem:[%s4827_s8 + $0x58] sm:$0xff]  ;;  %v74_v16 = vld [vmem:[%s4827_s8 + $0x50] sm:$0xff] }
   0x6   :  { %53 = vperm.xlu0 %3660, %v48_v3   ;;  %623 = vperm.xlu1 %3661, %v617_v4   ;;  %v73_v17 = vld [vmem:[%s4827_s8 + $0x48] sm:$0xff]  ;;  %v72_v18 = vld [vmem:[%s4827_s8 + $0x40] sm:$0xff]  ;;  %v71_v19 = vld [vmem:[%s4827_s8 + $0x38] sm:$0xff] }
   0x7   :  { %3302 = vmatprep.subr.msk.mxu0 %vm84_vm0, %v76_v14  ;;  %v70_v20 = vld [vmem:[%s4827_s8 + $0x30] sm:$0xff]  ;;  %v69_v21 = vld [vmem:[%s4827_s8 + $0x28] sm:$0xff]  ;;  %v68_v22 = vld [vmem:[%s4827_s8 + $0x20] sm:$0xff] }
   0x8   :  { %3303 = vmatpush3.msk.msra.mxu0 %vm84_vm0, %v76_v14  ;;  %v67_v23 = vld [vmem:[%s4827_s8 + $0x18] sm:$0xff]  ;;  %v66_v24 = vld [vmem:[%s4827_s8 + $0x10] sm:$0xff]  ;;  %v65_v25 = vld [vmem:[%s4827_s8 + $0x8] sm:$0xff] }
   0x9   :  { %3304 = vmatprep.subr.mxu0 %v75_v15  ;;  %v64_v26 = vld [vmem:[%s4827_s8] sm:$0xff]  ;;  %v3663_v30 = vld [vmem:[%s4829_s9 + $0x18] sm:$0xff]   ;;  %v3664_v34 = vld [vmem:[%s4829_s9 + $0x10] sm:$0xff]  }
   0xa   :  { %628 = vperm.xlu0 %3660, %v618_v7   ;;  %633 = vperm.xlu1 %3661, %v619_v8   ;;  %v3662_v36 = vld [vmem:[%s4829_s9 + $0x20] sm:$0xff]   ;;  %v3665_v40 = vld [vmem:[%s4829_s9 + $0x8] sm:$0xff]   ;;  %v3667_v51 = vld [vmem:[%s4831_s12 + $0x18] sm:$0xff]   ;;  %v615_v8 = vcvt.s32.f32 %v4024_v28 }
   0xb   :  { %3305 = vmatpush3.msra.mxu0 %v75_v15  ;;  %v419_v37 = vld [vmem:[%s4830_s7] sm:$0x3]  ;;  %v3668_v52 = vld [vmem:[%s4831_s12 + $0x10] sm:$0xff]   ;;  %v3669_v53 = vld [vmem:[%s4831_s12 + $0x8] sm:$0xff]  }
   0xc   :  { %3306 = vmatprep.subr.mxu0 %v74_v16  ;;  %v422_v39 = vpack.c.bf16 %v419_v37, %v419_v37  ;;  %v3666_v41 = vld [vmem:[%s4829_s9] sm:$0xff]  }
   0xd   :  { %3307 = vmatpush3.msra.mxu0 %v74_v16  ;;  %v3670_v54 = vld [vmem:[%s4831_s12] sm:$0xff]  }
   0xe   :  { %638 = vperm.xlu0 %3660, %v620_v9   ;;  %572 = vperm.xlu1 %3661, %v567_v10   ;;  %v423_v55 = vld [vmem:[%s4833_s13 + $0x2] ss:$0 sm:$0xff]  ;;  %v257_v57 = vld [vmem:[%s4833_s13] ss:$0 sm:$0xff] }
   0xf   :  { %3308 = vmatprep.subr.mxu0 %v73_v17 }
  0x10   :  { %3309 = vmatpush3.msra.mxu0 %v73_v17 }
  0x11   :  { %3310 = vmatprep.subr.mxu0 %v72_v18 }
  0x12   :  { %575 = vperm.xlu0 %3660, %v568_v11   ;;  %578 = vperm.xlu1 %3661, %v569_v12   ;;  %v616_v11 = vmul.f32 0.1, %v615_v8 }
  0x13   :  { %3311 = vmatpush3.msra.mxu0 %v72_v18 }
  0x14   :  { %3312 = vmatprep.subr.mxu0 %v71_v19 }
  0x15   :  { %3313 = vmatpush3.msra.mxu0 %v71_v19 }
  0x16   :  { %581 = vperm.xlu0 %3660, %v570_v13   ;;  %3314 = vmatprep.subr.mxu0 %v70_v20 }
  0x17   :  { %3315 = vmatpush3.msra.mxu0 %v70_v20 }
  0x18   :  { %3316 = vmatprep.subr.mxu0 %v69_v21 }
  0x19   :  { %3317 = vmatpush3.msra.mxu0 %v69_v21 }
  0x1a   :  { %3318 = vmatprep.subr.mxu0 %v68_v22 }
  0x1b   :  { %3319 = vmatpush3.msra.mxu0 %v68_v22 }
  0x1c   :  { %3320 = vmatprep.subr.mxu0 %v67_v23 }
  0x1d   :  { %3321 = vmatpush3.msra.mxu0 %v67_v23 }
  0x1e   :  { %3322 = vmatprep.subr.mxu0 %v66_v24 }
  0x1f   :  { %3323 = vmatpush3.msra.mxu0 %v66_v24 }
  0x20   :  { %3324 = vmatprep.subr.mxu0 %v65_v25 }
  0x21   :  { %3325 = vmatpush3.msra.mxu0 %v65_v25 }
  0x22   :  { %3326 = vmatprep.subr.mxu0 %v64_v26 }
  0x23   :  { %3327 = vmatpush3.msra.mxu0 %v64_v26 }
  0x24   :  { %3360 = vmatprep.subr.bf16.mxu0 %v3860_v5 }
  0x7d   :  { %v166_v29 = vpop.permute.xlu0 %165  ;;  %v57_v31 = vpop.permute.xlu1 %56 }
  0x7e   :  { %vm167_vm3 = vcmp.eq.s32.totalorder %v166_v29, %v4024_v28  ;;  %vm59_vm4 = vcmp.eq.s32.totalorder %v57_v31, %v4024_v28 }
  0x7f   :  { %v2958_v32 = vsel %vm167_vm3, 1.0, %v3860_v5  ;;  %v2954_v35 = vsel %vm59_vm4, 1.0, %v3860_v5 }
  0x80   :  { %3334 = vmatmul.mubr.msk.f32.vlgmr.msra.gmra.mxu1 %vm171_vm2, %v2958_v32 }
  0x81   :  { %v54_v33 = vpop.permute.xlu0 %53  ;;  %3337 = vmatpush3.bf16.msra.mxu1 %v3663_v30  ;;  %3344 = vmatprep.mubr.msk.bf16.mxu1 %vm3861_vm1, %v3860_v5  ;;  %v624_v12 = vpop.permute.xlu1 %623 }
  0x82   :  { %vm58_vm6 = vcmp.eq.s32.totalorder %v54_v33, %v4024_v28  ;;  %3338 = vmatprep.subr.bf16.mxu1 %v3860_v5  ;;  %v641_v15 = vsub.f32 %v624_v12, %v616_v11  ;;  %v3680_v12 = vld [vmem:[%s4829_s9 + $0xd8] sm:$0xff]  }
  0x83   :  { %v2953_v38 = vsel %vm58_vm6, 1.0, %v3860_v5  ;;  %vm1086_vm6 = vcmask 261120  }
  0x84   :  { %3328 = vmatprep.mubr.msk.f32.mxu0 %vm77_vm5, %v2953_v38  ;;  %v645_v18 = vmul.f32 -10.0, %v641_v15 }
  0x85   :  { %3329 = vmatmul.mubr.msk.f32.vlgmr.msra.gmra.mxu0 %vm77_vm5, %v2954_v35  ;;  %3339 = vmatpush3.bf16.msra.mxu1 %v3664_v34  ;;  %v629_v14 = vpop.permute.xlu0 %628  ;;  %v634_v33 = vpop.permute.xlu1 %633 }
  0x86   :  { %3361 = vmatpush3.bf16.msra.mxu0 %v3662_v36  ;;  %3362 = vmatprep.mubr.msk.bf16.mxu0 %vm3861_vm1, %v3860_v5  ;;  %v642_v16 = vsub.f32 %v629_v14, %v616_v11  ;;  %v649_v23 = vmul.f32 %v645_v18, %v641_v15 }
  0x87   :  { %3340 = vmatprep.subr.bf16.mxu1 %v3860_v5 }
  0x88   :  { %v646_v19 = vmul.f32 -10.0, %v642_v16  ;;  %v653_v32 = vmul.f32 1.442695, %v649_v23  ;;  %v3685_v23 = vld [vmem:[%s4832_s10 + $0x88] sm:$0xff]  }
  0x89   :  { %3363 = vmatmul.mubr.msk.bf16.vlgmr.msra.gmra.mxu0 %vm430_vm7, %v422_v39  ;;  %3341 = vmatpush3.bf16.msra.mxu1 %v3665_v40  ;;  %v639_v36 = vpop.permute.xlu0 %638  ;;  %v573_v14 = vpop.permute.xlu1 %572 }
  0x8a   :  { %3342 = vmatprep.subr.bf16.mxu1 %v3860_v5  ;;  %v650_v24 = vmul.f32 %v646_v19, %v642_v16  ;;  %vm583_vm11 = vcmp.eq.s32.totalorder %v573_v14, %v4024_v28  ;;  %v3682_v16 = vld [vmem:[%s4829_s9 + $0xc8] sm:$0xff]  }
  0x8c   :  { %v655_v35 = vmul.f32 1.442695, %v650_v24  ;;  %v3686_v24 = vld [vmem:[%s4832_s10 + $0x80] sm:$0xff]  }
  0x8d   :  { %3343 = vmatpush3.bf16.msra.mxu1 %v3666_v41  ;;  %v643_v41 = vsub.f32 %v634_v33, %v616_v11  ;;  %v576_v15 = vpop.permute.xlu0 %575 }
  0x8e   :  { %3348 = vmatprep.subr.bf16.mxu1 %v3860_v5  ;;  %vm584_vm12 = vcmp.eq.s32.totalorder %v576_v15, %v4024_v28 }
  0x8f   :  { %v3007_v18 = vsel %vm584_vm12, 1.0, %v3860_v5  ;;  %vm605_vm12 = vcmask 123904  }
 0x140   :  { %v244_v42 = vpop.f32.mrf.mxu1 }
 0x141   :  { %v256_v43 = vpack.c.bf16 %v244_v42, %v244_v42  ;;  %v3671_v42 = vld [vmem:[%s4829_s9 + $0x40] sm:$0xff]  }
 0x142   :  { %v3335_v44 = vpop.f32.mrf.mxu1 }
 0x143   :  { %3345 = vmatmul.mubr.msk.bf16.vlgmr.msra.gmra.mxu1 %vm282_vm8, %v256_v43  ;;  %v644_v43 = vsub.f32 %v639_v36, %v616_v11 }
 0x144   :  { %3356 = vmatprep.mubr.msk.bf16.mxu1 %vm3861_vm1, %v3860_v5  ;;  %3349 = vmatpush3.bf16.msra.mxu1 %v3667_v51 }
 0x145   :  { %v4062_v45 = vpop.f32.mrf.mxu0  ;;  %3350 = vmatprep.subr.bf16.mxu1 %v3860_v5  ;;  %v648_v51 = vmul.f32 -10.0, %v644_v43 }
 0x147   :  { %v4064_v46 = vpop.f32.mrf.mxu0 }
 0x148   :  { %3351 = vmatpush3.bf16.msra.mxu1 %v3668_v52  ;;  %v939_v19 = vpack.c.bf16 %v4062_v45, %v4064_v46 }
 0x149   :  { %v468_v47 = vpop.f32.mrf.mxu0  ;;  %3352 = vmatprep.subr.bf16.mxu1 %v3860_v5 }
 0x14a   :  { %v4085_v56 = vadd.f32 %v468_v47, %v423_v55  ;;  %v3673_v55 = vld [vmem:[%s4829_s9 + $0x30] sm:$0xff]  }
 0x14b   :  { %v3364_v48 = vpop.f32.mrf.mxu0 }
 0x14c   :  { %3353 = vmatpush3.bf16.msra.mxu1 %v3669_v53  ;;  %v475_v58 = vand.u32 2147483647, %v4085_v56  ;;  %v474_v52 = vmax.f32 %v4085_v56, 0.0 }
 0x14d   :  { %v471_v49 = vpop.f32.mrf.mxu0  ;;  %3354 = vmatprep.subr.bf16.mxu1 %v3860_v5 }
 0x14e   :  { %v476_v62 = vsub.f32 0.0, %v475_v58  ;;  %v647_v49 = vmul.f32 -10.0, %v643_v41 }
 0x14f   :  { %v3365_v50 = vpop.f32.mrf.mxu0 }
 0x150   :  { %3355 = vmatpush3.bf16.msra.mxu1 %v3670_v54  ;;  %v477_v4 = vmul.f32 1.442695, %v476_v62  ;;  %v3672_v50 = vld [vmem:[%s4829_s9 + $0x38] sm:$0xff]   ;;  %v651_v54 = vmul.f32 %v647_v49, %v643_v41  ;;  %v671_v41 = vld [vmem:[%s4833_s13 + $0x10] ss:$0 sm:$0xff] }
 0x151   :  { %3366 = vmatprep.subr.bf16.mxu1 %v3860_v5  ;;  %v3675_v62 = vld [vmem:[%s4832_s10 + $0x58] sm:$0xff]  }
 0x203   :  { %v320_v59 = vpop.f32.mrf.mxu1 }
 0x204   :  { %v321_v60 = vadd.f32 %v320_v59, %v257_v57  ;;  %v652_v57 = vmul.f32 %v648_v51, %v644_v43  ;;  %v657_v59 = vmul.f32 1.442695, %v651_v54 }
 0x205   :  { %v3346_v61 = vpop.f32.mrf.mxu1 }
 0x206   :  { %v327_v63 = vand.u32 2147483647, %v321_v60  ;;  %v326_v30 = vmax.f32 %v321_v60, 0.0  ;;  %v3674_v60 = vld [vmem:[%s4829_s9 + $0x28] sm:$0xff]   ;;  %v659_v56 = vmul.f32 1.442695, %v652_v57 }
 0x207   :  { %v323_v1 = vpop.f32.mrf.mxu1 }
 0x208   :  { %v328_v2 = vsub.f32 0.0, %v327_v63 }
 0x209   :  { %v3347_v3 = vpop.f32.mrf.mxu1 }
 0x20a   :  { %v329_v6 = vmul.f32 1.442695, %v328_v2  ;;  %v3676_v3 = vld [vmem:[%s4832_s10 + $0x50] sm:$0xff]  }
 0x20c   :  { %3781 = vpow2.f32 %v329_v6  ;;  %v3677_v6 = vld [vmem:[%s4832_s10 + $0x48] sm:$0xff]  }
 0x20d   :  { %3783 = vpow2.f32 %v477_v4 }
 0x219   :  { %v3782_v7 = vpop.eup %3781 }
 0x21a   :  { %v331_v9 = vadd.f32 1.0, %v3782_v7  ;;  %v3784_v10 = vpop.eup %3783  ;;  %v334_v17 = vmul.f32 -0.5, %v3782_v7  ;;  %v337_v21 = vand.u32 2147483647, %v3782_v7 }
 0x21b   :  { %v479_v13 = vadd.f32 1.0, %v3784_v10  ;;  %v482_v25 = vmul.f32 -0.5, %v3784_v10  ;;  %v485_v39 = vand.u32 2147483647, %v3784_v10 }
 0x21c   :  { %3785 = vlog2.f32 %v331_v9  ;;  %v335_v20 = vadd.f32 1.0, %v334_v17  ;;  %vm338_vm9 = vcmp.lt.f32.partialorder %v337_v21, 0.0004427343  ;;  %v3006_v17 = vsel %vm583_vm11, 1.0, %v3860_v5  ;;  %v3683_v21 = vld [vmem:[%s4832_s10 + $0x98] sm:$0xff]  }
 0x21d   :  { %3787 = vlog2.f32 %v479_v13  ;;  %v483_v37 = vadd.f32 1.0, %v482_v25  ;;  %vm486_vm10 = vcmp.lt.f32.partialorder %v485_v39, 0.0004427343  ;;  %v3681_v13 = vld [vmem:[%s4829_s9 + $0xd0] sm:$0xff]   ;;  %3390 = vmatprep.subr.bf16.mxu0 %v3683_v21  ;;  %v3687_v25 = vld [vmem:[%s4832_s10 + $0x78] sm:$0xff]  }
 0x21e   :  { %v336_v29 = vmul.f32 %v3782_v7, %v335_v20  ;;  %3789 = vpow2.f32 %v653_v32  ;;  %v3678_v7 = vld [vmem:[%s4832_s10 + $0x40] sm:$0xff]   ;;  %v4150_v20 = vpack.c.bf16 %v3007_v18, %v3006_v17  ;;  %3391 = vmatpush3.bf16.msra.mxu0 %v3683_v21 }
 0x21f   :  { %3791 = vpow2.f32 %v655_v35  ;;  %v484_v48 = vmul.f32 %v3784_v10, %v483_v37  ;;  %v3679_v10 = vld [vmem:[%s4829_s9 + $0xe0] sm:$0xff]  }
 0x220   :  { %3793 = vpow2.f32 %v657_v59  ;;  %v499_v35 = vld [vmem:[%s4833_s13 + $0x3] ss:$0 sm:$0xff] }
 0x221   :  { %3795 = vpow2.f32 %v659_v56 }
 0x229   :  { %v3786_v22 = vpop.eup %3785 }
 0x22a   :  { %v333_v26 = vmul.f32 0.6931472, %v3786_v22  ;;  %v3788_v38 = vpop.eup %3787  ;;  %v3684_v22 = vld [vmem:[%s4832_s10 + $0x90] sm:$0xff]  }
 0x22b   :  { %v481_v47 = vmul.f32 0.6931472, %v3788_v38  ;;  %v3790_v63 = vpop.eup %3789  ;;  %3392 = vmatprep.subr.bf16.mxu0 %v3684_v22 }
 0x22c   :  { %v339_v31 = vsel %vm338_vm9, %v336_v29, %v333_v26  ;;  %v3792_v1 = vpop.eup %3791  ;;  %3393 = vmatpush3.bf16.msra.mxu0 %v3684_v22  ;;  %v3688_v26 = vld [vmem:[%s4832_s10 + $0x70] sm:$0xff]   ;;  %v3689_v29 = vld [vmem:[%s4832_s10 + $0x68] sm:$0xff]  }
 0x22d   :  { %v340_v34 = vadd.f32 %v339_v31, %v326_v30  ;;  %v487_v53 = vsel %vm486_vm10, %v484_v48, %v481_v47  ;;  %v669_v4 = vpack.c.bf16 %v3792_v1, %v3790_v63  ;;  %v3794_v8 = vpop.eup %3793  ;;  %3394 = vmatprep.subr.bf16.mxu0 %v3685_v23  ;;  %v3690_v30 = vld [vmem:[%s4832_s10 + $0x60] sm:$0xff]  }
 0x22e   :  { %v488_v58 = vadd.f32 %v487_v53, %v474_v52  ;;  %v3796_v9 = vpop.eup %3795 }
 0x22f   :  { %v2966_v40 = vadd.f32 -0.6931472, %v340_v34  ;;  %v670_v11 = vpack.c.bf16 %v3796_v9, %v3794_v8 }
 0x230   :  { %v2974_v61 = vadd.f32 -0.6931472, %v488_v58  ;;  %3395 = vmatpush3.bf16.msra.mxu0 %v3685_v23 }
 0x231   :  { %v350_v44 = vpack.c.bf16 %v2966_v40, %v2966_v40  ;;  %3396 = vmatprep.subr.bf16.mxu0 %v3686_v24 }
 0x232   :  { %v498_v2 = vpack.c.bf16 %v2974_v61, %v2974_v61 }
 0x233   :  { %3357 = vmatmul.mubr.msk.bf16.vlgmr.msra.gmra.mxu1 %vm282_vm8, %v350_v44 }
 0x234   :  { %3367 = vmatpush3.bf16.msra.mxu1 %v3671_v42  ;;  %3374 = vmatprep.mubr.msk.bf16.mxu1 %vm3861_vm1, %v3860_v5 }
 0x235   :  { %3368 = vmatprep.subr.bf16.mxu1 %v3860_v5  ;;  %3397 = vmatpush3.bf16.msra.mxu0 %v3686_v24 }
 0x236   :  { %3398 = vmatprep.subr.bf16.mxu0 %v3687_v25 }
 0x238   :  { %3369 = vmatpush3.bf16.msra.mxu1 %v3672_v50 }
 0x239   :  { %3370 = vmatprep.subr.bf16.mxu1 %v3860_v5  ;;  %3399 = vmatpush3.bf16.msra.mxu0 %v3687_v25 }
 0x23a   :  { %3400 = vmatprep.subr.bf16.mxu0 %v3688_v26 }
 0x23c   :  { %3371 = vmatpush3.bf16.msra.mxu1 %v3673_v55 }
 0x23d   :  { %3372 = vmatprep.subr.bf16.mxu1 %v3860_v5  ;;  %3401 = vmatpush3.bf16.msra.mxu0 %v3688_v26 }
 0x23e   :  { %3402 = vmatprep.subr.bf16.mxu0 %v3689_v29 }
 0x240   :  { %3373 = vmatpush3.bf16.msra.mxu1 %v3674_v60 }
 0x241   :  { %3378 = vmatprep.subr.bf16.mxu1 %v3675_v62  ;;  %3403 = vmatpush3.bf16.msra.mxu0 %v3689_v29 }
 0x242   :  { %3404 = vmatprep.subr.bf16.mxu0 %v3690_v30 }
 0x243   :  { %3375 = vmatmul.mubr.msk.bf16.vlgmr.msra.gmra.mxu1 %vm282_vm8, %v498_v2  ;;  %v579_v2 = vpop.permute.xlu1 %578 }
 0x244   :  { %3379 = vmatpush3.bf16.msra.mxu1 %v3675_v62  ;;  %3386 = vmatprep.mubr.msk.bf16.mxu1 %vm282_vm8, %v669_v4  ;;  %v940_v4 = vld [vmem:[%s4833_s13 + $0x16] ss:$0 sm:$0xff]  ;;  %vm585_vm13 = vcmp.eq.s32.totalorder %v579_v2, %v4024_v28 }
 0x245   :  { %3380 = vmatprep.subr.bf16.mxu1 %v3676_v3  ;;  %3405 = vmatpush3.bf16.msra.mxu0 %v3690_v30  ;;  %v3008_v15 = vsel %vm585_vm13, 1.0, %v3860_v5 }
 0x246   :  { %3436 = vmatprep.subr.bf16.mxu0 %v3860_v5 }
 0x248   :  { %3381 = vmatpush3.bf16.msra.mxu1 %v3676_v3  ;;  %v582_v3 = vpop.permute.xlu0 %581 }
 0x249   :  { %3382 = vmatprep.subr.bf16.mxu1 %v3677_v6  ;;  %vm586_vm14 = vcmp.eq.s32.totalorder %v582_v3, %v4024_v28 }
 0x24c   :  { %3383 = vmatpush3.bf16.msra.mxu1 %v3677_v6 }
 0x24d   :  { %3384 = vmatprep.subr.bf16.mxu1 %v3678_v7 }
 0x250   :  { %3385 = vmatpush3.bf16.msra.mxu1 %v3678_v7 }
 0x251   :  { %3410 = vmatprep.subr.bf16.mxu1 %v3860_v5 }
 0x253   :  { %3387 = vmatmul.mubr.msk.bf16.vlgmr.msra.gmra.mxu1 %vm282_vm8, %v670_v11 }
 0x254   :  { %3411 = vmatpush3.bf16.msra.mxu1 %v3679_v10  ;;  %3418 = vmatprep.mubr.msk.bf16.mxu1 %vm3861_vm1, %v3860_v5 }
 0x255   :  { %3412 = vmatprep.subr.bf16.mxu1 %v3860_v5 }
 0x258   :  { %3413 = vmatpush3.bf16.msra.mxu1 %v3680_v12 }
 0x259   :  { %3414 = vmatprep.subr.bf16.mxu1 %v3860_v5 }
 0x25c   :  { %3415 = vmatpush3.bf16.msra.mxu1 %v3681_v13 }
 0x25d   :  { %3416 = vmatprep.subr.bf16.mxu1 %v3860_v5 }
 0x260   :  { %3417 = vmatpush3.bf16.msra.mxu1 %v3682_v16  ;;  %v3009_v16 = vsel %vm586_vm14, 1.0, %v3860_v5 }
 0x263   :  { %3419 = vmatmul.mubr.msk.bf16.vlgmr.msra.gmra.mxu1 %vm282_vm8, %v939_v19  ;;  %v4211_v19 = vpack.c.bf16 %v3009_v16, %v3008_v15  ;;  %v4234_v15 = vshrl.u32 %v50_v27, 7 }
 0x264   :  { %3424 = vmatprep.mubr.msk.bf16.mxu1 %vm430_vm7, %v4150_v20 }
 0x2f3   :  { %v4180_v31 = vpop.f32.mrf.mxu1 }
 0x2f5   :  { %v3358_v32 = vpop.f32.mrf.mxu1 }
 0x2f7   :  { %v416_v33 = vpop.f32.mrf.mxu1 }
 0x2f9   :  { %v3359_v34 = vpop.f32.mrf.mxu1 }
 0x303   :  { %v561_v36 = vpop.f32.mrf.mxu1 }
 0x304   :  { %v4185_v37 = vadd.f32 %v561_v36, %v499_v35 }
 0x305   :  { %v3376_v38 = vpop.f32.mrf.mxu1 }
 0x306   :  { %1369 = vrot.lane.b32.xlu0 %v4185_v37, %s3862_s1 }
 0x307   :  { %v564_v39 = vpop.f32.mrf.mxu1 }
 0x309   :  { %v3377_v40 = vpop.f32.mrf.mxu1 }
 0x313   :  { %v3388_v42 = vpop.f32.mrf.mxu1 }
 0x314   :  { %v4192_v43 = vadd.f32 %v3388_v42, %v671_v41 }
 0x315   :  { %v736_v44 = vpop.f32.mrf.mxu1 }
 0x316   :  { %v757_v47 = vand.u32 2147483647, %v4192_v43  ;;  %v4195_v48 = vadd.f32 %v736_v44, %v671_v41 }
 0x317   :  { %v3389_v49 = vpop.f32.mrf.mxu1 }
 0x318   :  { %v761_v50 = vsub.f32 0.0, %v757_v47  ;;  %v755_v51 = vand.u32 2147483647, %v4195_v48  ;;  %v4198_v52 = vadd.f32 %v3389_v49, %v671_v41 }
 0x319   :  { %v739_v53 = vpop.f32.mrf.mxu1 }
 0x31a   :  { %v767_v54 = vmul.f32 1.442695, %v761_v50  ;;  %v759_v55 = vsub.f32 0.0, %v755_v51  ;;  %v758_v57 = vand.u32 2147483647, %v4198_v52  ;;  %v4201_v58 = vadd.f32 %v739_v53, %v671_v41 }
 0x31c   :  { %3797 = vpow2.f32 %v767_v54  ;;  %v763_v59 = vmul.f32 1.442695, %v759_v55  ;;  %v762_v60 = vsub.f32 0.0, %v758_v57  ;;  %v756_v56 = vand.u32 2147483647, %v4201_v58 }
 0x31d   :  { %v754_v57 = vmax.f32 %v4198_v52, 0.0 }
 0x31e   :  { %3799 = vpow2.f32 %v763_v59  ;;  %v769_v61 = vmul.f32 1.442695, %v762_v60  ;;  %v760_v62 = vsub.f32 0.0, %v756_v56  ;;  %v751_v56 = vmax.f32 %v4195_v48, 0.0  ;;  %v833_v48 = vld [vmem:[%s4833_s13 + $0x11] ss:$0 sm:$0xff] }
 0x320   :  { %3801 = vpow2.f32 %v769_v61  ;;  %v765_v63 = vmul.f32 1.442695, %v760_v62  ;;  %v753_v62 = vmax.f32 %v4192_v43, 0.0 }
 0x322   :  { %3803 = vpow2.f32 %v765_v63 }
 0x323   :  { %v1002_v1 = vpop.f32.mrf.mxu1 }
 0x324   :  { %v1003_v8 = vadd.f32 %v1002_v1, %v940_v4 }
 0x325   :  { %v3420_v6 = vpop.f32.mrf.mxu1 }
 0x327   :  { %v1005_v7 = vpop.f32.mrf.mxu1 }
 0x328   :  { %v1006_v9 = vadd.f32 %v1005_v7, %v940_v4  ;;  %v752_v4 = vmax.f32 %v4201_v58, 0.0 }
 0x329   :  { %v3798_v10 = vpop.eup %3797  ;;  %v3421_v11 = vpop.f32.mrf.mxu1 }
 0x32a   :  { %v789_v12 = vadd.f32 1.0, %v3798_v10  ;;  %v1019_v13 = vpack.c.bf16 %v1006_v9, %v1003_v8  ;;  %v792_v24 = vmul.f32 -0.5, %v3798_v10  ;;  %v795_v38 = vand.u32 2147483647, %v3798_v10 }
 0x32b   :  { %v3800_v14 = vpop.eup %3799 }
 0x32c   :  { %3805 = vlog2.f32 %v789_v12  ;;  %v771_v17 = vadd.f32 1.0, %v3800_v14  ;;  %3422 = vmatprep.subr.bf16.mxu1 %v1019_v13  ;;  %v774_v25 = vmul.f32 -0.5, %v3800_v14  ;;  %v793_v30 = vadd.f32 1.0, %v792_v24 }
 0x32d   :  { %v3802_v18 = vpop.eup %3801  ;;  %3423 = vmatpush3.bf16.msra.mxu1 %v1019_v13  ;;  %v777_v34 = vand.u32 2147483647, %v3800_v14  ;;  %vm796_vm0 = vcmp.lt.f32.partialorder %v795_v38, 0.0004427343  ;;  %v590_v24 = vadd.s32 8, %v4234_v15 }
 0x32e   :  { %3807 = vlog2.f32 %v771_v17  ;;  %v798_v21 = vadd.f32 1.0, %v3802_v18  ;;  %3428 = vmatprep.subr.bf16.mxu1 %v3860_v5  ;;  %v801_v26 = vmul.f32 -0.5, %v3802_v18  ;;  %v775_v32 = vadd.f32 1.0, %v774_v25  ;;  %v3691_v17 = vld [vmem:[%s4829_s9 + $0x100] sm:$0xff]  }
 0x32f   :  { %v3804_v22 = vpop.eup %3803  ;;  %v804_v39 = vand.u32 2147483647, %v3802_v18  ;;  %v794_v44 = vmul.f32 %v3798_v10, %v793_v30  ;;  %vm4218_vm15 = vcmp.lt.f32.partialorder %v777_v34, 0.0004427343 }
 0x330   :  { %3809 = vlog2.f32 %v798_v21  ;;  %3425 = vmatmul.mubr.msk.bf16.vlgmr.msra.gmra.mxu1 %vm430_vm7, %v4211_v19  ;;  %v780_v23 = vadd.f32 1.0, %v3804_v22  ;;  %v783_v33 = vmul.f32 -0.5, %v3804_v22  ;;  %v802_v35 = vadd.f32 1.0, %v801_v26  ;;  %v3692_v21 = vld [vmem:[%s4829_s9 + $0xf8] sm:$0xff]   ;;  %v2980_v26 = vld [vmem:[%s4834_s2] ss:$0 sm:$0xff] }
 0x331   :  { %3432 = vmatprep.mubr.msk.bf16.mxu1 %vm3861_vm1, %v3860_v5  ;;  %v776_v47 = vmul.f32 %v3800_v14, %v775_v32  ;;  %v786_v54 = vand.u32 2147483647, %v3804_v22  ;;  %vm805_vm2 = vcmp.lt.f32.partialorder %v804_v39, 0.0004427343  ;;  %vm595_vm4 = vcmp.eq.s32.totalorder %v2980_v26, %v4234_v15 }
 0x332   :  { %3811 = vlog2.f32 %v780_v23  ;;  %v784_v49 = vadd.f32 1.0, %v783_v33  ;;  %v803_v53 = vmul.f32 %v3802_v18, %v802_v35  ;;  %vm596_vm5 = vcmp.eq.s32.totalorder %v2980_v26, %v590_v24 }
 0x333   :  { %vm787_vm3 = vcmp.lt.f32.partialorder %v786_v54, 0.0004427343  ;;  %v3012_v39 = vsel %vm595_vm4, 1.0, %v3860_v5 }
 0x334   :  { %v785_v2 = vmul.f32 %v3804_v22, %v784_v49 }
 0x339   :  { %v3806_v29 = vpop.eup %3805 }
 0x33a   :  { %v791_v40 = vmul.f32 0.6931472, %v3806_v29 }
 0x33b   :  { %v3808_v36 = vpop.eup %3807 }
 0x33c   :  { %v773_v41 = vmul.f32 0.6931472, %v3808_v36  ;;  %v797_v60 = vsel %vm796_vm0, %v794_v44, %v791_v40  ;;  %v3013_v40 = vsel %vm596_vm5, 1.0, %v3860_v5  ;;  %v3693_v44 = vld [vmem:[%s4829_s9 + $0xf0] sm:$0xff]   ;;  %vm2941_vm5 = vcmask 254976  }
 0x33d   :  { %v3810_v42 = vpop.eup %3809  ;;  %v809_v6 = vadd.f32 %v797_v60, %v753_v62  ;;  %v3698_v60 = vld [vmem:[%s4829_s9 + $0x108] sm:$0xff]  }
 0x33e   :  { %v800_v51 = vmul.f32 0.6931472, %v3810_v42  ;;  %v779_v55 = vsel %vm4218_vm15, %v776_v47, %v773_v41  ;;  %v4255_v42 = vpack.c.bf16 %v3013_v40, %v3012_v39  ;;  %v3694_v47 = vld [vmem:[%s4829_s9 + $0xe8] sm:$0xff]   ;;  %v4304_v40 = vld [vmem:[%s4832_s10 + $0x38] sm:$0xff]  }
 0x33f   :  { %v3812_v59 = vpop.eup %3811  ;;  %v807_v3 = vadd.f32 %v779_v55, %v751_v56  ;;  %v2991_v11 = vadd.f32 -0.6931472, %v809_v6  ;;  %v3695_v55 = vld [vmem:[%s4829_s9 + $0x120] sm:$0xff]   ;;  %v1140_v56 = vld [vmem:[%s4833_s13 + $0x17] ss:$0 sm:$0xff] }
 0x340   :  { %v806_v61 = vsel %vm805_vm2, %v803_v53, %v800_v51  ;;  %v782_v1 = vmul.f32 0.6931472, %v3812_v59  ;;  %v3697_v59 = vld [vmem:[%s4829_s9 + $0x110] sm:$0xff]  }
 0x341   :  { %v810_v63 = vadd.f32 %v806_v61, %v754_v57  ;;  %v2989_v52 = vadd.f32 -0.6931472, %v807_v3  ;;  %v3696_v57 = vld [vmem:[%s4829_s9 + $0x118] sm:$0xff]  }
 0x342   :  { %v788_v7 = vsel %vm787_vm3, %v785_v2, %v782_v1 }
 0x343   :  { %v808_v8 = vadd.f32 %v788_v7, %v752_v4  ;;  %v2992_v9 = vadd.f32 -0.6931472, %v810_v63 }
 0x345   :  { %v2990_v10 = vadd.f32 -0.6931472, %v808_v8  ;;  %v832_v13 = vpack.c.bf16 %v2992_v9, %v2991_v11 }
 0x347   :  { %v831_v12 = vpack.c.bf16 %v2990_v10, %v2989_v52 }
 0x349   :  { %3406 = vmatprep.mubr.bf16.mxu0 %v831_v12 }
 0x34a   :  { %3407 = vmatmul.mubr.bf16.vlgmr.msra.gmra.mxu0 %v832_v13 }
 0x34b   :  { %3444 = vmatprep.mubr.msk.bf16.mxu0 %vm3861_vm1, %v3860_v5  ;;  %3437 = vmatpush3.bf16.msra.mxu0 %v3691_v17 }
 0x34c   :  { %3438 = vmatprep.subr.bf16.mxu0 %v3860_v5 }
 0x34f   :  { %3439 = vmatpush3.bf16.msra.mxu0 %v3692_v21 }
 0x350   :  { %3440 = vmatprep.subr.bf16.mxu0 %v3860_v5 }
 0x353   :  { %3441 = vmatpush3.bf16.msra.mxu0 %v3693_v44  ;;  %v4310_v44 = vld [vmem:[%s4832_s10 + $0x30] sm:$0xff]  }
 0x354   :  { %3442 = vmatprep.subr.bf16.mxu0 %v3860_v5 }
 0x357   :  { %3443 = vmatpush3.bf16.msra.mxu0 %v3694_v47  ;;  %v4317_v47 = vld [vmem:[%s4832_s10 + $0x28] sm:$0xff]  }
 0x358   :  { %3460 = vmatprep.subr.bf16.mxu0 %v3860_v5 }
 0x3f0   :  { %v3426_v43 = vpop.f32.mrf.mxu1 }
 0x3f2   :  { %v1060_v58 = vpop.f32.mrf.mxu1 }
 0x3f4   :  { %v3427_v22 = vpop.f32.mrf.mxu1 }
 0x3f6   :  { %v1063_v34 = vpop.f32.mrf.mxu1 }
 0x40a   :  { %v3408_v14 = vpop.f32.mrf.mxu0 }
 0x40b   :  { %v925_v16 = vadd.f32 %v3408_v14, %v833_v48 }
 0x40c   :  { %v916_v18 = vpop.f32.mrf.mxu0 }
 0x40d   :  { %1907 = vrot.lane.b32.xlu0 %v925_v16, %s3862_s1  ;;  %v917_v27 = vadd.f32 %v916_v18, %v833_v48  ;;  %v1077_v30 = vmul.f32 %v3426_v43, %v925_v16 }
 0x40e   :  { %v3409_v23 = vpop.f32.mrf.mxu0 }
 0x40f   :  { %v928_v25 = vadd.f32 %v3409_v23, %v833_v48  ;;  %v1075_v38 = vmul.f32 %v1060_v58, %v917_v27 }
 0x410   :  { %v919_v29 = vpop.f32.mrf.mxu0 }
 0x411   :  { %v1078_v32 = vmul.f32 %v3427_v22, %v928_v25  ;;  %v920_v33 = vadd.f32 %v919_v29, %v833_v48  ;;  %1903 = vrot.lane.b32.xlu0 %v917_v27, %s3862_s1 }
 0x413   :  { %v1085_v35 = vpack.c.bf16 %v1078_v32, %v1077_v30  ;;  %v1076_v36 = vmul.f32 %v1063_v34, %v920_v33 }
 0x415   :  { %1909 = vrot.lane.b32.xlu0 %v928_v25, %s3862_s1  ;;  %3429 = vmatpush3.bf16.msra.mxu1 %v1085_v35  ;;  %v1084_v41 = vpack.c.bf16 %v1076_v36, %v1075_v38  ;;  %v2981_v38 = vld [vmem:[%s4835_s3] ss:$0 sm:$0xff] }
 0x416   :  { %3430 = vmatprep.subr.bf16.mxu1 %v3860_v5  ;;  %vm602_vm11 = vcmp.eq.s32.totalorder %v2981_v38, %v4234_v15 }
 0x417   :  { %v2982_v39 = vsel %vm602_vm11, 1.0, %v3860_v5 }
 0x419   :  { %1905 = vrot.lane.b32.xlu0 %v920_v33, %s3862_s1  ;;  %3431 = vmatpush3.bf16.msra.mxu1 %v1084_v41  ;;  %v606_v41 = vsel %vm605_vm12, %v2982_v39, 0.0 }
 0x41a   :  { %3448 = vmatprep.subr.bf16.mxu1 %v3860_v5  ;;  %607 = vadd.xlane.f32.xlu1 %v606_v41 }
 0x41c   :  { %3433 = vmatmul.mubr.msk.bf16.vlgmr.msra.gmra.mxu1 %vm1086_vm6, %v4255_v42 }
 0x41d   :  { %3456 = vmatprep.mubr.msk.bf16.mxu1 %vm3861_vm1, %v3860_v5  ;;  %3449 = vmatpush3.bf16.msra.mxu1 %v3695_v55 }
 0x41e   :  { %3450 = vmatprep.subr.bf16.mxu1 %v3860_v5 }
 0x421   :  { %3451 = vmatpush3.bf16.msra.mxu1 %v3696_v57 }
 0x422   :  { %3452 = vmatprep.subr.bf16.mxu1 %v3860_v5 }
 0x425   :  { %3453 = vmatpush3.bf16.msra.mxu1 %v3697_v59 }
 0x426   :  { %3454 = vmatprep.subr.bf16.mxu1 %v3860_v5 }
 0x429   :  { %3455 = vmatpush3.bf16.msra.mxu1 %v3698_v60 }
 0x42a   :  { %3466 = vmatprep.subr.bf16.mxu1 %v3860_v5 }
 0x4dc   :  { %v1124_v49 = vpop.f32.mrf.mxu1 }
 0x4de   :  { %v3434_v50 = vpop.f32.mrf.mxu1 }
 0x4df   :  { %v4331_v50 = vld [vmem:[%s4832_s10 + $0x18] sm:$0xff]  }
 0x4e0   :  { %v1127_v51 = vpop.f32.mrf.mxu1 }
 0x4e1   :  { %v1139_v53 = vpack.c.bf16 %v1127_v51, %v1124_v49  ;;  %v4325_v49 = vld [vmem:[%s4832_s10 + $0x20] sm:$0xff]   ;;  %v4338_v51 = vld [vmem:[%s4832_s10 + $0x10] sm:$0xff]  }
 0x4e2   :  { %v3435_v54 = vpop.f32.mrf.mxu1 }
 0x4e3   :  { %3445 = vmatmul.mubr.msk.bf16.vlgmr.msra.gmra.mxu0 %vm282_vm8, %v1139_v53  ;;  %v4345_v53 = vld [vmem:[%s4832_s10 + $0x8] sm:$0xff]   ;;  %v1250_v54 = vld [vmem:[%s4833_s13 + $0x20] ss:$0 sm:$0xff] }
 0x4e4   :  { %3462 = vmatprep.mubr.msk.bf16.mxu0 %vm3861_vm1, %v3860_v5 }
 0x5a3   :  { %v1202_v61 = vpop.f32.mrf.mxu0 }
 0x5a4   :  { %v1203_v62 = vadd.f32 %v1202_v61, %v1140_v56 }
 0x5a5   :  { %v3446_v63 = vpop.f32.mrf.mxu0 }
 0x5a6   :  { %v1211_v1 = vand.u32 2147483647, %v1203_v62  ;;  %v1209_v27 = vmax.f32 %v1203_v62, 0.0 }
 0x5a7   :  { %v1205_v2 = vpop.f32.mrf.mxu0 }
 0x5a8   :  { %v1213_v3 = vsub.f32 0.0, %v1211_v1  ;;  %v1206_v4 = vadd.f32 %v1205_v2, %v1140_v56  ;;  %v4363_v2 = vpack.c.bf16 %v2982_v39, %v2982_v39 }
 0x5a9   :  { %v3447_v6 = vpop.f32.mrf.mxu0 }
 0x5aa   :  { %v1215_v7 = vmul.f32 1.442695, %v1213_v3  ;;  %v1212_v8 = vand.u32 2147483647, %v1206_v4  ;;  %v1210_v30 = vmax.f32 %v1206_v4, 0.0 }
 0x5ac   :  { %3813 = vpow2.f32 %v1215_v7  ;;  %v1214_v9 = vsub.f32 0.0, %v1212_v8  ;;  %v1370_v8 = vpop.permute.xlu0 %1369 }
 0x5ae   :  { %v1217_v52 = vmul.f32 1.442695, %v1214_v9 }
 0x5b0   :  { %3815 = vpow2.f32 %v1217_v52 }
 0x5b9   :  { %v3814_v10 = vpop.eup %3813 }
 0x5ba   :  { %v1219_v11 = vadd.f32 1.0, %v3814_v10  ;;  %v1222_v43 = vmul.f32 -0.5, %v3814_v10  ;;  %v1225_v14 = vand.u32 2147483647, %v3814_v10 }
 0x5bc   :  { %3817 = vlog2.f32 %v1219_v11  ;;  %v1223_v48 = vadd.f32 1.0, %v1222_v43  ;;  %vm1226_vm9 = vcmp.lt.f32.partialorder %v1225_v14, 0.0004427343  ;;  %v4394_v43 = vld [vmem:[%s4829_s9 + $0x78] sm:$0xff]   ;;  %v4415_v14 = vld [vmem:[%s4829_s9 + $0x60] sm:$0xff]  }
 0x5bd   :  { %v3816_v12 = vpop.eup %3815 }
 0x5be   :  { %v1228_v13 = vadd.f32 1.0, %v3816_v12  ;;  %v1231_v58 = vmul.f32 -0.5, %v3816_v12  ;;  %v1224_v18 = vmul.f32 %v3814_v10, %v1223_v48  ;;  %v1234_v22 = vand.u32 2147483647, %v3816_v12  ;;  %v4401_v48 = vld [vmem:[%s4829_s9 + $0x70] sm:$0xff]  }
 0x5c0   :  { %3819 = vlog2.f32 %v1228_v13  ;;  %v1232_v21 = vadd.f32 1.0, %v1231_v58  ;;  %vm1235_vm10 = vcmp.lt.f32.partialorder %v1234_v22, 0.0004427343  ;;  %v4387_v13 = vld [vmem:[%s4829_s9 + $0x80] sm:$0xff]   ;;  %v4408_v58 = vld [vmem:[%s4829_s9 + $0x68] sm:$0xff]   ;;  %v4449_v22 = vld [vmem:[%s4829_s9 + $0x98] sm:$0xff]  }
 0x5c2   :  { %v1233_v26 = vmul.f32 %v3816_v12, %v1232_v21  ;;  %v4443_v21 = vld [vmem:[%s4829_s9 + $0xa0] sm:$0xff]  }
 0x5c9   :  { %v3818_v16 = vpop.eup %3817 }
 0x5ca   :  { %v1221_v17 = vmul.f32 0.6931472, %v3818_v16  ;;  %v4422_v16 = vld [vmem:[%s4829_s9 + $0x58] sm:$0xff]  }
 0x5cc   :  { %v1227_v23 = vsel %vm1226_vm9, %v1224_v18, %v1221_v17  ;;  %v4429_v17 = vld [vmem:[%s4829_s9 + $0x50] sm:$0xff]   ;;  %v4436_v18 = vld [vmem:[%s4829_s9 + $0x48] sm:$0xff]  }
 0x5cd   :  { %v3820_v24 = vpop.eup %3819  ;;  %v1237_v29 = vadd.f32 %v1227_v23, %v1209_v27  ;;  %v4456_v23 = vld [vmem:[%s4829_s9 + $0x90] sm:$0xff]  }
 0x5ce   :  { %v1230_v25 = vmul.f32 0.6931472, %v3820_v24  ;;  %v4464_v24 = vld [vmem:[%s4833_s13 + $0x4] ss:$0 sm:$0xff] }
 0x5cf   :  { %v3020_v34 = vadd.f32 -0.6931472, %v1237_v29 }
 0x5d0   :  { %v1236_v32 = vsel %vm1235_vm10, %v1233_v26, %v1230_v25 }
 0x5d1   :  { %v1238_v33 = vadd.f32 %v1236_v32, %v1210_v30 }
 0x5d3   :  { %v3021_v35 = vadd.f32 -0.6931472, %v1238_v33 }
 0x5d5   :  { %v1249_v36 = vpack.c.bf16 %v3021_v35, %v3020_v34 }
 0x5d7   :  { %3457 = vmatmul.mubr.msk.bf16.vlgmr.msra.gmra.mxu1 %vm282_vm8, %v1249_v36 }
 0x5d8   :  { %3482 = vmatprep.mubr.msk.bf16.mxu1 %vm3861_vm1, %v3860_v5  ;;  %3467 = vmatpush3.bf16.msra.mxu1 %v4304_v40 }
 0x5d9   :  { %3468 = vmatprep.subr.bf16.mxu1 %v3860_v5 }
 0x5dc   :  { %3469 = vmatpush3.bf16.msra.mxu1 %v4310_v44 }
 0x5dd   :  { %3470 = vmatprep.subr.bf16.mxu1 %v3860_v5 }
 0x5e0   :  { %3471 = vmatpush3.bf16.msra.mxu1 %v4317_v47 }
 0x5e1   :  { %3472 = vmatprep.subr.bf16.mxu1 %v3860_v5 }
 0x5e4   :  { %3473 = vmatpush3.bf16.msra.mxu1 %v4325_v49 }
 0x5e5   :  { %3474 = vmatprep.subr.bf16.mxu1 %v3860_v5 }
 0x5e8   :  { %3475 = vmatpush3.bf16.msra.mxu1 %v4331_v50 }
 0x5e9   :  { %3476 = vmatprep.subr.bf16.mxu1 %v3860_v5 }
 0x5ec   :  { %3477 = vmatpush3.bf16.msra.mxu1 %v4338_v51 }
 0x5ed   :  { %3478 = vmatprep.subr.bf16.mxu1 %v3860_v5 }
 0x5f0   :  { %3479 = vmatpush3.bf16.msra.mxu1 %v4345_v53 }
 0x5f1   :  { %3480 = vmatprep.subr.bf16.mxu1 %v3860_v5 }
 0x697   :  { %v1312_v55 = vpop.f32.mrf.mxu1 }
 0x698   :  { %v1313_v59 = vadd.f32 %v1312_v55, %v1250_v54 }
 0x699   :  { %v3458_v57 = vpop.f32.mrf.mxu1 }
 0x69a   :  { %v4354_v62 = vadd.f32 %v1313_v59, %v4064_v46  ;;  %v608_v46 = vpop.xlane.xlu1 %607 }
 0x69b   :  { %v1315_v60 = vpop.f32.mrf.mxu1  ;;  %v609_v3 = vmax.f32 %v608_v46, 1.0 }
 0x69c   :  { %v1316_v56 = vadd.f32 %v1315_v60, %v1250_v54 }
 0x69d   :  { %v3459_v61 = vpop.f32.mrf.mxu1  ;;  %3821 = vrcp.f32 %v609_v3  ;;  %v4472_v3 = vld [vmem:[%s4829_s9 + $0x88] sm:$0xff]  }
 0x69e   :  { %v4357_v63 = vadd.f32 %v4062_v45, %v1316_v56  ;;  %v4374_v45 = vld [vmem:[%s4832_s10] sm:$0xff]  }
 0x69f   :  { %3481 = vmatpush3.bf16.msra.mxu1 %v4374_v45 }
 0x6a0   :  { %v4361_v1 = vpack.c.bf16 %v4357_v63, %v4354_v62  ;;  %3506 = vmatprep.subr.bf16.mxu1 %v3860_v5 }
 0x6a2   :  { %3461 = vmatpush3.bf16.msra.mxu0 %v4361_v1 }
 0x6a3   :  { %3486 = vmatprep.subr.bf16.mxu0 %v3860_v5 }
 0x6a5   :  { %3463 = vmatmul.mubr.msk.bf16.vlgmr.msra.gmra.mxu0 %vm430_vm7, %v4363_v2 }
 0x6a6   :  { %3502 = vmatprep.mubr.msk.bf16.mxu0 %vm3861_vm1, %v3860_v5  ;;  %3487 = vmatpush3.bf16.msra.mxu0 %v4387_v13 }
 0x6a7   :  { %3488 = vmatprep.subr.bf16.mxu0 %v3860_v5 }
 0x6aa   :  { %v4378_v4 = vpop.eup %3821  ;;  %3489 = vmatpush3.bf16.msra.mxu0 %v4394_v43 }
 0x6ab   :  { %3490 = vmatprep.subr.bf16.mxu0 %v3860_v5 }
 0x6ae   :  { %3491 = vmatpush3.bf16.msra.mxu0 %v4401_v48 }
 0x6af   :  { %3492 = vmatprep.subr.bf16.mxu0 %v3860_v5 }
 0x6b2   :  { %3493 = vmatpush3.bf16.msra.mxu0 %v4408_v58 }
 0x6b3   :  { %3494 = vmatprep.subr.bf16.mxu0 %v3860_v5 }
 0x6b6   :  { %3495 = vmatpush3.bf16.msra.mxu0 %v4415_v14 }
 0x6b7   :  { %3496 = vmatprep.subr.bf16.mxu0 %v3860_v5 }
 0x6ba   :  { %3497 = vmatpush3.bf16.msra.mxu0 %v4422_v16 }
 0x6bb   :  { %3498 = vmatprep.subr.bf16.mxu0 %v3860_v5 }
 0x6be   :  { %3499 = vmatpush3.bf16.msra.mxu0 %v4429_v17 }
 0x6bf   :  { %3500 = vmatprep.subr.bf16.mxu0 %v3860_v5 }
 0x6c2   :  { %3501 = vmatpush3.bf16.msra.mxu0 %v4436_v18 }
 0x6c3   :  { %3518 = vmatprep.subr.bf16.mxu0 %v3860_v5 }
 0x765   :  { %v1360_v6 = vpop.f32.mrf.mxu0 }
 0x766   :  { %v1367_v7 = vmul.f32 %v4378_v4, %v1360_v6  ;;  %v4479_v6 = vld [vmem:[%s4833_s13 + $0x5] ss:$0 sm:$0xff] }
 0x767   :  { %v3464_v9 = vpop.f32.mrf.mxu0 }
 0x768   :  { %v1372_v52 = vsel %vm282_vm8, %v1367_v7, %v1370_v8 }
 0x769   :  { %v1389_v10 = vpack.c.bf16 %v1372_v52, %v1372_v52  ;;  %v1363_v11 = vpop.f32.mrf.mxu0  ;;  %v3719_v52 = vld [vmem:[%s4829_s9 + $0x140] sm:$0xff]  }
 0x76b   :  { %v3465_v12 = vpop.f32.mrf.mxu0  ;;  %3483 = vmatmul.mubr.bf16.vlgmr.msra.gmra.mxu1 %v1389_v10 }
 0x76c   :  { %3514 = vmatprep.mubr.msk.bf16.mxu1 %vm3861_vm1, %v3860_v5  ;;  %3507 = vmatpush3.bf16.msra.mxu1 %v4443_v21 }
 0x76d   :  { %3508 = vmatprep.subr.bf16.mxu1 %v3860_v5 }
 0x770   :  { %3509 = vmatpush3.bf16.msra.mxu1 %v4449_v22 }
 0x771   :  { %3510 = vmatprep.subr.bf16.mxu1 %v3860_v5 }
 0x774   :  { %3511 = vmatpush3.bf16.msra.mxu1 %v4456_v23 }
 0x775   :  { %3512 = vmatprep.subr.bf16.mxu1 %v3860_v5 }
 0x778   :  { %3513 = vmatpush3.bf16.msra.mxu1 %v4472_v3 }
 0x779   :  { %3530 = vmatprep.subr.bf16.mxu1 %v3860_v5 }
 0x82b   :  { %v1473_v27 = vpop.f32.mrf.mxu1 }
 0x82c   :  { %v1474_v25 = vadd.f32 %v1473_v27, %v4464_v24  ;;  %v3720_v27 = vld [vmem:[%s4829_s9 + $0x138] sm:$0xff]  }
 0x82d   :  { %v3484_v26 = vpop.f32.mrf.mxu1 }
 0x82e   :  { %v1480_v29 = vand.u32 2147483647, %v1474_v25  ;;  %v1479_v59 = vmax.f32 %v1474_v25, 0.0  ;;  %v3721_v25 = vld [vmem:[%s4829_s9 + $0x130] sm:$0xff]   ;;  %v3722_v26 = vld [vmem:[%s4829_s9 + $0x128] sm:$0xff]  }
 0x82f   :  { %v1476_v30 = vpop.f32.mrf.mxu1 }
 0x830   :  { %v1481_v32 = vsub.f32 0.0, %v1480_v29  ;;  %v4508_v29 = vld [vmem:[%s4829_s9 + $0xc0] sm:$0xff]   ;;  %v4515_v30 = vld [vmem:[%s4829_s9 + $0xb8] sm:$0xff]  }
 0x831   :  { %v3485_v33 = vpop.f32.mrf.mxu1 }
 0x832   :  { %v1482_v34 = vmul.f32 1.442695, %v1481_v32  ;;  %v4529_v32 = vld [vmem:[%s4829_s9 + $0xa8] sm:$0xff]   ;;  %v4535_v33 = vld [vmem:[%s4833_s13 + $0x6] ss:$0 sm:$0xff] }
 0x834   :  { %3823 = vpow2.f32 %v1482_v34 }
 0x841   :  { %v3824_v35 = vpop.eup %3823 }
 0x842   :  { %v1484_v36 = vadd.f32 1.0, %v3824_v35  ;;  %v1487_v38 = vmul.f32 -0.5, %v3824_v35  ;;  %v1490_v41 = vand.u32 2147483647, %v3824_v35 }
 0x844   :  { %3825 = vlog2.f32 %v1484_v36  ;;  %v1488_v39 = vadd.f32 1.0, %v1487_v38  ;;  %vm1491_vm13 = vcmp.lt.f32.partialorder %v1490_v41, 0.0004427343 }
 0x846   :  { %v1489_v57 = vmul.f32 %v3824_v35, %v1488_v39 }
 0x851   :  { %v3826_v54 = vpop.eup %3825 }
 0x852   :  { %v1486_v55 = vmul.f32 0.6931472, %v3826_v54 }
 0x854   :  { %v1492_v60 = vsel %vm1491_vm13, %v1489_v57, %v1486_v55 }
 0x855   :  { %v1493_v56 = vadd.f32 %v1492_v60, %v1479_v59  ;;  %v1780_v59 = vld [vmem:[%s4833_s13 + $0x21] ss:$0 sm:$0xff] }
 0x857   :  { %v3036_v61 = vadd.f32 -0.6931472, %v1493_v56 }
 0x859   :  { %v1511_v46 = vpack.c.bf16 %v3036_v61, %v3036_v61 }
 0x85b   :  { %3503 = vmatmul.mubr.bf16.vlgmr.msra.gmra.mxu0 %v1511_v46 }
 0x85c   :  { %3526 = vmatprep.mubr.msk.bf16.mxu0 %vm3861_vm1, %v3860_v5  ;;  %3519 = vmatpush3.bf16.msra.mxu0 %v4508_v29 }
 0x85d   :  { %3520 = vmatprep.subr.bf16.mxu0 %v3860_v5 }
 0x860   :  { %3521 = vmatpush3.bf16.msra.mxu0 %v4515_v30 }
 0x861   :  { %3522 = vmatprep.subr.bf16.mxu0 %v3860_v5 }
 0x91b   :  { %v1595_v7 = vpop.f32.mrf.mxu0 }
 0x91c   :  { %v1596_v8 = vadd.f32 %v1595_v7, %v4479_v6 }
 0x91d   :  { %v3504_v9 = vpop.f32.mrf.mxu0 }
 0x91e   :  { %v1609_v10 = vpack.c.bf16 %v1596_v8, %v1596_v8 }
 0x91f   :  { %v1598_v11 = vpop.f32.mrf.mxu0 }
 0x920   :  { %3515 = vmatmul.mubr.msk.bf16.vlgmr.msra.gmra.mxu1 %vm282_vm8, %v1609_v10 }
 0x921   :  { %3531 = vmatpush3.bf16.msra.mxu1 %v3719_v52  ;;  %v3505_v12 = vpop.f32.mrf.mxu0  ;;  %3538 = vmatprep.mubr.msk.bf16.mxu1 %vm3861_vm1, %v3860_v5 }
 0x922   :  { %3532 = vmatprep.subr.bf16.mxu1 %v3860_v5 }
 0x925   :  { %3533 = vmatpush3.bf16.msra.mxu1 %v3720_v27 }
 0x926   :  { %3534 = vmatprep.subr.bf16.mxu1 %v3860_v5 }
 0x929   :  { %3535 = vmatpush3.bf16.msra.mxu1 %v3721_v25 }
 0x92a   :  { %3536 = vmatprep.subr.bf16.mxu1 %v3860_v5 }
 0x92d   :  { %3537 = vmatpush3.bf16.msra.mxu1 %v3722_v26 }
 0x92e   :  { %3556 = vmatprep.subr.bf16.mxu1 %v3860_v5 }
 0x930   :  { %3539 = vmatmul.mubr.msk.bf16.vlgmr.msra.gmra.mxu1 %vm282_vm8, %v4361_v1  ;;  %v4522_v1 = vld [vmem:[%s4829_s9 + $0xb0] sm:$0xff]  }
 0x931   :  { %3564 = vmatprep.mubr.msk.bf16.mxu1 %vm3861_vm1, %v3860_v5  ;;  %3523 = vmatpush3.bf16.msra.mxu0 %v4522_v1 }
 0x932   :  { %3524 = vmatprep.subr.bf16.mxu0 %v3860_v5 }
 0x935   :  { %3525 = vmatpush3.bf16.msra.mxu0 %v4529_v32 }
 0x9e0   :  { %v1672_v34 = vpop.f32.mrf.mxu1 }
 0x9e1   :  { %v1673_v35 = vadd.f32 %v1672_v34, %v4535_v33 }
 0x9e2   :  { %v3516_v36 = vpop.f32.mrf.mxu1 }
 0x9e3   :  { %v1679_v38 = vand.u32 2147483647, %v1673_v35  ;;  %v1678_v34 = vmax.f32 %v1673_v35, 0.0  ;;  %v1908_v35 = vpop.permute.xlu0 %1907 }
 0x9e4   :  { %v1675_v39 = vpop.f32.mrf.mxu1 }
 0x9e5   :  { %v1680_v41 = vsub.f32 0.0, %v1679_v38 }
 0x9e6   :  { %v3517_v54 = vpop.f32.mrf.mxu1 }
 0x9e7   :  { %v1681_v55 = vmul.f32 1.442695, %v1680_v41  ;;  %v4552_v54 = vld [vmem:[%s4833_s13 + $0x7] ss:$0 sm:$0xff] }
 0x9e9   :  { %3827 = vpow2.f32 %v1681_v55 }
 0x9f0   :  { %v1842_v57 = vpop.f32.mrf.mxu1 }
 0x9f1   :  { %v1843_v61 = vadd.f32 %v1842_v57, %v1780_v59 }
 0x9f2   :  { %v3540_v60 = vpop.f32.mrf.mxu1 }
 0x9f4   :  { %v1845_v56 = vpop.f32.mrf.mxu1 }
 0x9f5   :  { %v1846_v46 = vadd.f32 %v1845_v56, %v1780_v59  ;;  %v1904_v59 = vpop.permute.xlu0 %1903 }
 0x9f6   :  { %v3828_v7 = vpop.eup %3827  ;;  %v3541_v8 = vpop.f32.mrf.mxu1 }
 0x9f7   :  { %v1683_v9 = vadd.f32 1.0, %v3828_v7  ;;  %v1849_v52 = vpack.c.bf16 %v1846_v46, %v1843_v61  ;;  %v1686_v10 = vmul.f32 -0.5, %v3828_v7  ;;  %v1689_v12 = vand.u32 2147483647, %v3828_v7  ;;  %v610_v61 = vld [vmem:[%s4836_s4] sm:$0x3] }
 0x9f8   :  { %v3727_v46 = vld [vmem:[%s4829_s9 + $0x160] sm:$0xff]  }
 0x9f9   :  { %3829 = vlog2.f32 %v1683_v9  ;;  %3542 = vmatprep.subr.bf16.mxu0 %v1849_v52  ;;  %v1687_v11 = vadd.f32 1.0, %v1686_v10  ;;  %vm1690_vm14 = vcmp.lt.f32.partialorder %v1689_v12, 0.0004427343  ;;  %3557 = vmatpush3.bf16.msra.mxu1 %v3727_v46 }
 0x9fa   :  { %3558 = vmatprep.subr.bf16.mxu1 %v3860_v5 }
 0x9fb   :  { %v1688_v26 = vmul.f32 %v3828_v7, %v1687_v11  ;;  %v1910_v7 = vpop.permute.xlu0 %1909 }
 0x9ff   :  { %v1906_v12 = vpop.permute.xlu0 %1905 }
 0xa06   :  { %v3830_v27 = vpop.eup %3829 }
 0xa07   :  { %v1685_v25 = vmul.f32 0.6931472, %v3830_v27 }
 0xa09   :  { %v1691_v36 = vsel %vm1690_vm14, %v1688_v26, %v1685_v25 }
 0xa0a   :  { %v1692_v38 = vadd.f32 %v1691_v36, %v1678_v34 }
 0xa0c   :  { %v3050_v39 = vadd.f32 -0.6931472, %v1692_v38  ;;  %v3729_v38 = vld [vmem:[%s4829_s9 + $0x150] sm:$0xff]  }
 0xa0e   :  { %v1702_v41 = vpack.c.bf16 %v3050_v39, %v3050_v39  ;;  %v3730_v39 = vld [vmem:[%s4829_s9 + $0x148] sm:$0xff]  }
 0xa10   :  { %3527 = vmatmul.mubr.msk.bf16.vlgmr.msra.gmra.mxu0 %vm282_vm8, %v1702_v41 }
 0xa11   :  { %3543 = vmatpush3.bf16.msra.mxu0 %v1849_v52  ;;  %3544 = vmatprep.mubr.msk.bf16.mxu0 %vm430_vm7, %v4150_v20 }
 0xa12   :  { %3548 = vmatprep.subr.bf16.mxu0 %v3860_v5 }
 0xa18   :  { %3545 = vmatmul.mubr.msk.bf16.vlgmr.msra.gmra.mxu0 %vm430_vm7, %v4211_v19 }
 0xa19   :  { %3552 = vmatprep.mubr.msk.bf16.mxu0 %vm3861_vm1, %v3860_v5 }
 0xad0   :  { %v1765_v55 = vpop.f32.mrf.mxu0 }
 0xad1   :  { %v1766_v57 = vadd.f32 %v1765_v55, %v4552_v54 }
 0xad2   :  { %v3528_v60 = vpop.f32.mrf.mxu0 }
 0xad3   :  { %v4556_v20 = vadd.f32 %v1766_v57, %v4185_v37  ;;  %v3728_v37 = vld [vmem:[%s4829_s9 + $0x158] sm:$0xff]  }
 0xad4   :  { %v1768_v56 = vpop.f32.mrf.mxu0  ;;  %3559 = vmatpush3.bf16.msra.mxu1 %v3728_v37  ;;  %v3732_v60 = vld [vmem:[%s4829_s9 + $0x178] sm:$0xff]  }
 0xad5   :  { %2195 = vrot.lane.b32.xlu0 %v4556_v20, %s3862_s1  ;;  %3560 = vmatprep.subr.bf16.mxu1 %v3860_v5  ;;  %v3733_v56 = vld [vmem:[%s4829_s9 + $0x170] sm:$0xff]  }
 0xad6   :  { %v3529_v19 = vpop.f32.mrf.mxu0 }
 0xad7   :  { %v3734_v19 = vld [vmem:[%s4829_s9 + $0x168] sm:$0xff]  }
 0xad8   :  { %v3546_v8 = vpop.f32.mrf.mxu0  ;;  %3561 = vmatpush3.bf16.msra.mxu1 %v3729_v38 }
 0xad9   :  { %612 = vperm.xlu0 %3660, %v610_v61   ;;  %v1917_v10 = vmul.f32 %v3546_v8, %v1908_v35  ;;  %3562 = vmatprep.subr.bf16.mxu1 %v3860_v5  ;;  %v1971_v61 = vld [vmem:[%s4833_s13 + $0x22] ss:$0 sm:$0xff] }
 0xada   :  { %v1884_v9 = vpop.f32.mrf.mxu0 }
 0xadb   :  { %v1915_v34 = vmul.f32 %v1904_v59, %v1884_v9  ;;  %v3731_v59 = vld [vmem:[%s4829_s9 + $0x180] sm:$0xff]  }
 0xadc   :  { %v3547_v52 = vpop.f32.mrf.mxu0  ;;  %3563 = vmatpush3.bf16.msra.mxu1 %v3730_v39 }
 0xadd   :  { %v1918_v11 = vmul.f32 %v3547_v52, %v1910_v7  ;;  %3580 = vmatprep.subr.bf16.mxu1 %v3860_v5 }
 0xade   :  { %v1887_v27 = vpop.f32.mrf.mxu0 }
 0xadf   :  { %v1920_v25 = vpack.c.bf16 %v1918_v11, %v1917_v10  ;;  %v1916_v26 = vmul.f32 %v1906_v12, %v1887_v27 }
 0xae1   :  { %3549 = vmatpush3.bf16.msra.mxu0 %v1920_v25  ;;  %v1919_v36 = vpack.c.bf16 %v1916_v26, %v1915_v34 }
 0xae2   :  { %3550 = vmatprep.subr.bf16.mxu0 %v3860_v5 }
 0xae5   :  { %3551 = vmatpush3.bf16.msra.mxu0 %v1919_v36 }
 0xae6   :  { %3568 = vmatprep.subr.bf16.mxu0 %v3860_v5 }
 0xae8   :  { %3553 = vmatmul.mubr.msk.bf16.vlgmr.msra.gmra.mxu0 %vm1086_vm6, %v4255_v42 }
 0xae9   :  { %3576 = vmatprep.mubr.msk.bf16.mxu0 %vm3861_vm1, %v3860_v5  ;;  %3569 = vmatpush3.bf16.msra.mxu0 %v3731_v59 }
 0xaea   :  { %3570 = vmatprep.subr.bf16.mxu0 %v3860_v5 }
 0xaed   :  { %3571 = vmatpush3.bf16.msra.mxu0 %v3732_v60 }
 0xaee   :  { %3572 = vmatprep.subr.bf16.mxu0 %v3860_v5 }
 0xaf1   :  { %3573 = vmatpush3.bf16.msra.mxu0 %v3733_v56 }
 0xaf2   :  { %3574 = vmatprep.subr.bf16.mxu0 %v3860_v5 }
 0xaf5   :  { %3575 = vmatpush3.bf16.msra.mxu0 %v3734_v19 }
 0xaf6   :  { %3586 = vmatprep.subr.bf16.mxu0 %v3860_v5 }
 0xba8   :  { %v1955_v41 = vpop.f32.mrf.mxu0 }
 0xbaa   :  { %v3554_v35 = vpop.f32.mrf.mxu0 }
 0xbac   :  { %v1958_v42 = vpop.f32.mrf.mxu0 }
 0xbad   :  { %v1970_v55 = vpack.c.bf16 %v1958_v42, %v1955_v41 }
 0xbae   :  { %v3555_v57 = vpop.f32.mrf.mxu0 }
 0xbaf   :  { %3565 = vmatmul.mubr.msk.bf16.vlgmr.msra.gmra.mxu1 %vm282_vm8, %v1970_v55 }
 0xbb0   :  { %3582 = vmatprep.mubr.msk.bf16.mxu1 %vm3861_vm1, %v3860_v5 }
 0xc6f   :  { %v2033_v46 = vpop.f32.mrf.mxu1 }
 0xc70   :  { %v2034_v7 = vadd.f32 %v2033_v46, %v1971_v61 }
 0xc71   :  { %v3566_v8 = vpop.f32.mrf.mxu1 }
 0xc72   :  { %v2042_v37 = vand.u32 2147483647, %v2034_v7  ;;  %v2040_v8 = vmax.f32 %v2034_v7, 0.0 }
 0xc73   :  { %v2036_v9 = vpop.f32.mrf.mxu1 }
 0xc74   :  { %v2044_v52 = vsub.f32 0.0, %v2042_v37  ;;  %v2037_v10 = vadd.f32 %v2036_v9, %v1971_v61 }
 0xc75   :  { %v3567_v11 = vpop.f32.mrf.mxu1 }
 0xc76   :  { %v2046_v12 = vmul.f32 1.442695, %v2044_v52  ;;  %v2043_v27 = vand.u32 2147483647, %v2037_v10  ;;  %v2041_v11 = vmax.f32 %v2037_v10, 0.0 }
 0xc78   :  { %3831 = vpow2.f32 %v2046_v12  ;;  %v2045_v25 = vsub.f32 0.0, %v2043_v27 }
 0xc7a   :  { %v2048_v26 = vmul.f32 1.442695, %v2045_v25 }
 0xc7c   :  { %3833 = vpow2.f32 %v2048_v26 }
 0xc85   :  { %v3832_v34 = vpop.eup %3831 }
 0xc86   :  { %v2050_v36 = vadd.f32 1.0, %v3832_v34  ;;  %v2053_v41 = vmul.f32 -0.5, %v3832_v34  ;;  %v2056_v55 = vand.u32 2147483647, %v3832_v34 }
 0xc88   :  { %3835 = vlog2.f32 %v2050_v36  ;;  %v2054_v35 = vadd.f32 1.0, %v2053_v41  ;;  %vm2057_vm15 = vcmp.lt.f32.partialorder %v2056_v55, 0.0004427343 }
 0xc89   :  { %v3834_v38 = vpop.eup %3833 }
 0xc8a   :  { %v2059_v39 = vadd.f32 1.0, %v3834_v38  ;;  %v2062_v42 = vmul.f32 -0.5, %v3834_v38  ;;  %v2055_v60 = vmul.f32 %v3832_v34, %v2054_v35  ;;  %v2065_v19 = vand.u32 2147483647, %v3834_v38 }
 0xc8c   :  { %3837 = vlog2.f32 %v2059_v39  ;;  %v2063_v56 = vadd.f32 1.0, %v2062_v42  ;;  %vm2066_vm0 = vcmp.lt.f32.partialorder %v2065_v19, 0.0004427343 }
 0xc8e   :  { %v2064_v9 = vmul.f32 %v3834_v38, %v2063_v56 }
 0xc95   :  { %v3836_v57 = vpop.eup %3835 }
 0xc96   :  { %v2052_v59 = vmul.f32 0.6931472, %v3836_v57 }
 0xc98   :  { %v2058_v61 = vsel %vm2057_vm15, %v2055_v60, %v2052_v59 }
 0xc99   :  { %v3838_v46 = vpop.eup %3837  ;;  %v2068_v52 = vadd.f32 %v2058_v61, %v2040_v8 }
 0xc9a   :  { %v2061_v37 = vmul.f32 0.6931472, %v3838_v46 }
 0xc9b   :  { %v3069_v25 = vadd.f32 -0.6931472, %v2068_v52  ;;  %v3755_v52 = vld [vmem:[%s4837_s11 + $0x74] ss:$8 sps:$4 sm:$0xff]  }
 0xc9c   :  { %v2067_v12 = vsel %vm2066_vm0, %v2064_v9, %v2061_v37 }
 0xc9d   :  { %v2069_v27 = vadd.f32 %v2067_v12, %v2041_v11  ;;  %v3756_v11 = vld [vmem:[%s4837_s11 + $0x60] ss:$8 sps:$4 sm:$0xff]   ;;  %v3761_v12 = vld [vmem:[%s4837_s11 + $0x54] ss:$8 sps:$4 sm:$0xff]  }
 0xc9f   :  { %v3070_v26 = vadd.f32 -0.6931472, %v2069_v27  ;;  %v3759_v27 = vld [vmem:[%s4837_s11 + $0x50] ss:$8 sps:$4 sm:$0xff]  }
 0xca1   :  { %v2080_v36 = vpack.c.bf16 %v3070_v26, %v3069_v25 }
 0xca3   :  { %3577 = vmatmul.mubr.msk.bf16.vlgmr.msra.gmra.mxu0 %vm282_vm8, %v2080_v36 }
 0xca4   :  { %3587 = vmatpush3.bf16.msra.mxu0 %v4304_v40  ;;  %3602 = vmatprep.mubr.msk.bf16.mxu0 %vm3861_vm1, %v3860_v5  ;;  %v2081_v40 = vld [vmem:[%s4833_s13 + $0x23] ss:$0 sm:$0xff] }
 0xca5   :  { %3588 = vmatprep.subr.bf16.mxu0 %v3860_v5 }
 0xca8   :  { %3589 = vmatpush3.bf16.msra.mxu0 %v4310_v44 }
 0xca9   :  { %3590 = vmatprep.subr.bf16.mxu0 %v3860_v5 }
 0xcac   :  { %3591 = vmatpush3.bf16.msra.mxu0 %v4317_v47 }
 0xcad   :  { %3592 = vmatprep.subr.bf16.mxu0 %v3860_v5 }
 0xcb0   :  { %3593 = vmatpush3.bf16.msra.mxu0 %v4325_v49 }
 0xcb1   :  { %3594 = vmatprep.subr.bf16.mxu0 %v3860_v5 }
 0xcb4   :  { %3595 = vmatpush3.bf16.msra.mxu0 %v4331_v50 }
 0xcb5   :  { %3596 = vmatprep.subr.bf16.mxu0 %v3860_v5 }
 0xcb8   :  { %3597 = vmatpush3.bf16.msra.mxu0 %v4338_v51 }
 0xcb9   :  { %3598 = vmatprep.subr.bf16.mxu0 %v3860_v5 }
 0xcbc   :  { %3599 = vmatpush3.bf16.msra.mxu0 %v4345_v53 }
 0xcbd   :  { %3600 = vmatprep.subr.bf16.mxu0 %v3860_v5 }
 0xcc0   :  { %3601 = vmatpush3.bf16.msra.mxu0 %v4374_v45 }
 0xcc1   :  { %3626 = vmatprep.subr.bf16.mxu0 %v3860_v5 }
 0xd63   :  { %v2143_v44 = vpop.f32.mrf.mxu0 }
 0xd64   :  { %v2144_v49 = vadd.f32 %v2143_v44, %v2081_v40 }
 0xd65   :  { %v3578_v47 = vpop.f32.mrf.mxu0 }
 0xd66   :  { %v2150_v10 = vadd.f32 %v2144_v49, %v4354_v62 }
 0xd67   :  { %v2146_v50 = vpop.f32.mrf.mxu0 }
 0xd68   :  { %v2147_v7 = vadd.f32 %v2146_v50, %v2081_v40 }
 0xd69   :  { %v3579_v51 = vpop.f32.mrf.mxu0 }
 0xd6a   :  { %v2151_v53 = vadd.f32 %v2147_v7, %v4357_v63 }
 0xd6c   :  { %v4631_v34 = vpack.c.bf16 %v2151_v53, %v2150_v10 }
 0xd6e   :  { %3581 = vmatpush3.bf16.msra.mxu1 %v4631_v34 }
 0xd6f   :  { %3606 = vmatprep.subr.bf16.mxu1 %v3860_v5 }
 0xd71   :  { %3583 = vmatmul.mubr.msk.bf16.vlgmr.msra.gmra.mxu1 %vm430_vm7, %v4363_v2  ;;  %v2196_v2 = vpop.permute.xlu0 %2195 }
 0xd72   :  { %3607 = vmatpush3.bf16.msra.mxu1 %v4387_v13  ;;  %3622 = vmatprep.mubr.msk.bf16.mxu1 %vm3861_vm1, %v3860_v5 }
 0xd73   :  { %3608 = vmatprep.subr.bf16.mxu1 %v3860_v5 }
 0xd75   :  { %v613_v8 = vpop.permute.xlu0 %612 }
 0xd76   :  { %3609 = vmatpush3.bf16.msra.mxu1 %v4394_v43  ;;  %vm614_vm3 = vcmp.eq.s32.totalorder %v613_v8, %v4024_v28  ;;  %v3753_v28 = vld [vmem:[%s4837_s11 + $0x70] ss:$8 sps:$4 sm:$0xff]  }
 0xd77   :  { %3610 = vmatprep.subr.bf16.mxu1 %v3860_v5 }
 0xd7a   :  { %3611 = vmatpush3.bf16.msra.mxu1 %v4401_v48 }
 0xd7b   :  { %3612 = vmatprep.subr.bf16.mxu1 %v3860_v5 }
 0xd7e   :  { %3613 = vmatpush3.bf16.msra.mxu1 %v4408_v58 }
 0xd7f   :  { %3614 = vmatprep.subr.bf16.mxu1 %v3860_v5 }
 0xd82   :  { %3615 = vmatpush3.bf16.msra.mxu1 %v4415_v14 }
 0xd83   :  { %3616 = vmatprep.subr.bf16.mxu1 %v3860_v5 }
 0xd86   :  { %3617 = vmatpush3.bf16.msra.mxu1 %v4422_v16 }
 0xd87   :  { %3618 = vmatprep.subr.bf16.mxu1 %v3860_v5 }
 0xd8a   :  { %3619 = vmatpush3.bf16.msra.mxu1 %v4429_v17 }
 0xd8b   :  { %3620 = vmatprep.subr.bf16.mxu1 %v3860_v5 }
 0xd8e   :  { %3621 = vmatpush3.bf16.msra.mxu1 %v4436_v18 }
 0xd8f   :  { %3638 = vmatprep.subr.bf16.mxu1 %v3860_v5 }
 0xe31   :  { %v2187_v62 = vpop.f32.mrf.mxu1 }
 0xe32   :  { %v2193_v63 = vmul.f32 %v4378_v4, %v2187_v62 }
 0xe33   :  { %v3584_v45 = vpop.f32.mrf.mxu1 }
 0xe34   :  { %v2198_v13 = vsel %vm282_vm8, %v2193_v63, %v2196_v2 }
 0xe35   :  { %v2199_v43 = vpack.c.bf16 %v2198_v13, %v2198_v13  ;;  %v2190_v48 = vpop.f32.mrf.mxu1 }
 0xe37   :  { %v3585_v58 = vpop.f32.mrf.mxu1  ;;  %3603 = vmatmul.mubr.bf16.vlgmr.msra.gmra.mxu0 %v2199_v43 }
 0xe38   :  { %3627 = vmatpush3.bf16.msra.mxu0 %v4443_v21  ;;  %3634 = vmatprep.mubr.msk.bf16.mxu0 %vm3861_vm1, %v3860_v5 }
 0xe39   :  { %3628 = vmatprep.subr.bf16.mxu0 %v3860_v5 }
 0xe3c   :  { %3629 = vmatpush3.bf16.msra.mxu0 %v4449_v22 }
 0xe3d   :  { %3630 = vmatprep.subr.bf16.mxu0 %v3860_v5 }
 0xe40   :  { %3631 = vmatpush3.bf16.msra.mxu0 %v4456_v23 }
 0xe41   :  { %3632 = vmatprep.subr.bf16.mxu0 %v3860_v5 }
 0xe44   :  { %3633 = vmatpush3.bf16.msra.mxu0 %v4472_v3 }
 0xe45   :  { %3650 = vmatprep.subr.bf16.mxu0 %v3860_v5 }
 0xef7   :  { %v2234_v4 = vpop.f32.mrf.mxu0 }
 0xef8   :  { %v2235_v14 = vadd.f32 %v2234_v4, %v4464_v24 }
 0xef9   :  { %v3604_v16 = vpop.f32.mrf.mxu0 }
 0xefa   :  { %v2241_v17 = vand.u32 2147483647, %v2235_v14  ;;  %v2240_v59 = vmax.f32 %v2235_v14, 0.0  ;;  %v3735_v16 = vld [vmem:[%s4837_s11 + $0x30] ss:$8 sps:$4 sm:$0xff]  }
 0xefb   :  { %v2237_v18 = vpop.f32.mrf.mxu0 }
 0xefc   :  { %v2242_v21 = vsub.f32 0.0, %v2241_v17  ;;  %v3740_v18 = vld [vmem:[%s4837_s11 + $0x24] ss:$8 sps:$4 sm:$0xff]  }
 0xefd   :  { %v3605_v38 = vpop.f32.mrf.mxu0 }
 0xefe   :  { %v2243_v39 = vmul.f32 1.442695, %v2242_v21  ;;  %v3738_v21 = vld [vmem:[%s4837_s11 + $0x20] ss:$8 sps:$4 sm:$0xff]   ;;  %v3743_v38 = vld [vmem:[%s4837_s11 + $0x14] ss:$8 sps:$4 sm:$0xff]  }
 0xf00   :  { %3839 = vpow2.f32 %v2243_v39  ;;  %v3741_v39 = vld [vmem:[%s4837_s11 + $0x10] ss:$8 sps:$4 sm:$0xff]  }
 0xf0d   :  { %v3840_v22 = vpop.eup %3839 }
 0xf0e   :  { %v2245_v41 = vadd.f32 1.0, %v3840_v22  ;;  %v2248_v23 = vmul.f32 -0.5, %v3840_v22  ;;  %v2251_v42 = vand.u32 2147483647, %v3840_v22 }
 0xf10   :  { %3841 = vlog2.f32 %v2245_v41  ;;  %v2249_v35 = vadd.f32 1.0, %v2248_v23  ;;  %vm2252_vm2 = vcmp.lt.f32.partialorder %v2251_v42, 0.0004427343  ;;  %v3744_v41 = vld [vmem:[%s4837_s11] ss:$8 sps:$4 sm:$0xff]  }
 0xf11   :  { %v3749_v23 = vld [vmem:[%s4837_s11 + $0x94] ss:$8 sps:$4 sm:$0xff]  }
 0xf12   :  { %v2250_v57 = vmul.f32 %v3840_v22, %v2249_v35  ;;  %v3746_v22 = vld [vmem:[%s4837_s11 + $0x4] ss:$8 sps:$4 sm:$0xff]   ;;  %v3747_v35 = vld [vmem:[%s4837_s11 + $0x90] ss:$8 sps:$4 sm:$0xff]  }
 0xf1d   :  { %v3842_v55 = vpop.eup %3841 }
 0xf1e   :  { %v2247_v3 = vmul.f32 0.6931472, %v3842_v55  ;;  %v3752_v55 = vld [vmem:[%s4837_s11 + $0x84] ss:$8 sps:$4 sm:$0xff]  }
 0xf20   :  { %v2253_v60 = vsel %vm2252_vm2, %v2250_v57, %v2247_v3  ;;  %v351_v3 = vld [vmem:[%s4833_s13 + $0x1] ss:$0 sm:$0xff] }
 0xf21   :  { %v2254_v24 = vadd.f32 %v2253_v60, %v2240_v59  ;;  %v3750_v57 = vld [vmem:[%s4837_s11 + $0x80] ss:$8 sps:$4 sm:$0xff]   ;;  %v414_v59 = vadd.f32 %v4180_v31, %v351_v3 }
 0xf23   :  { %v3077_v56 = vadd.f32 -0.6931472, %v2254_v24  ;;  %v2653_v60 = vpack.c.bf16 %v414_v59, %v414_v59  ;;  %v3764_v24 = vld [vmem:[%s4837_s11 + $0x44] ss:$8 sps:$4 sm:$0xff]  }
 0xf25   :  { %v2256_v19 = vpack.c.bf16 %v3077_v56, %v3077_v56  ;;  %v3762_v56 = vld [vmem:[%s4837_s11 + $0x40] ss:$8 sps:$4 sm:$0xff]  }
 0xf27   :  { %3623 = vmatmul.mubr.bf16.vlgmr.msra.gmra.mxu1 %v2256_v19 }
 0xf28   :  { %3639 = vmatpush3.bf16.msra.mxu1 %v4508_v29  ;;  %3646 = vmatprep.mubr.msk.bf16.mxu1 %vm3861_vm1, %v3860_v5 }
 0xf29   :  { %3640 = vmatprep.subr.bf16.mxu1 %v3860_v5 }
 0xf2c   :  { %3641 = vmatpush3.bf16.msra.mxu1 %v4515_v30 }
 0xf2d   :  { %3642 = vmatprep.subr.bf16.mxu1 %v3860_v5 }
 0xf30   :  { %3643 = vmatpush3.bf16.msra.mxu1 %v4522_v1  ;;  %v3081_v1 = vsel %vm614_vm3, 1.0, %v3860_v5 }
 0xf31   :  { %3644 = vmatprep.subr.bf16.mxu1 %v3860_v5 }
 0xf34   :  { %3645 = vmatpush3.bf16.msra.mxu1 %v4529_v32  ;;  %v2404_v32 = vpack.c.bf16 %v3081_v1, %v3081_v1 }
 0xfe7   :  { %v2291_v61 = vpop.f32.mrf.mxu1 }
 0xfe8   :  { %v2292_v46 = vadd.f32 %v2291_v61, %v4479_v6  ;;  %v3737_v6 = vld [vmem:[%s4837_s11 + $0x34] ss:$8 sps:$4 sm:$0xff]  }
 0xfe9   :  { %v3624_v29 = vpop.f32.mrf.mxu1  ;;  %2521 = vmatprep.subr.bf16.mxu1 %v3737_v6 }
 0xfea   :  { %v2297_v37 = vpack.c.bf16 %v2292_v46, %v2292_v46 }
 0xfeb   :  { %v2294_v9 = vpop.f32.mrf.mxu1 }
 0xfec   :  { %3635 = vmatmul.mubr.msk.bf16.vlgmr.msra.gmra.mxu0 %vm282_vm8, %v2297_v37 }
 0xfed   :  { %3651 = vmatpush3.bf16.msra.mxu0 %v4631_v34  ;;  %v3625_v30 = vpop.f32.mrf.mxu1  ;;  %3652 = vmatprep.mubr.msk.bf16.mxu0 %vm3861_vm1, %v3860_v5  ;;  %v3758_v5 = vld [vmem:[%s4837_s11 + $0x64] ss:$8 sps:$4 sm:$0xff]  }
 0xfee   :  { %2614 = vmatprep.subr.bf16.mxu0 %v3755_v52 }
 0xff4   :  { %3653 = vmatmul.mubr.msk.bf16.vlgmr.msra.gmra.mxu0 %vm430_vm7, %v2404_v32 }
 0xff5   :  { %2638 = vmatprep.mubr.bf16.mxu0 %v3859_v0  ;;  %2615 = vmatpush1.bf16.msra.mxu0 %v3753_v28 }
 0xff6   :  { %2616 = vmatprep.subr.bf16.mxu0 %v3758_v5  ;;  %v3767_v5 = vld [vmem:[%s4831_s12 + $0x90] sm:$0xff]  }
 0xff9   :  { %2617 = vmatpush1.bf16.msra.mxu0 %v3756_v11  ;;  %v3768_v11 = vld [vmem:[%s4831_s12 + $0x50] sm:$0xff]  }
 0xffa   :  { %2618 = vmatprep.subr.bf16.mxu0 %v3761_v12  ;;  %v3769_v12 = vld [vmem:[%s4831_s12 + $0x88] sm:$0xff]  }
 0xffd   :  { %2619 = vmatpush1.bf16.msra.mxu0 %v3759_v27  ;;  %v3770_v27 = vld [vmem:[%s4831_s12 + $0x48] sm:$0xff]  }
 0xffe   :  { %2620 = vmatprep.subr.bf16.mxu0 %v3764_v24 }
0x1001   :  { %2621 = vmatpush1.bf16.msra.mxu0 %v3762_v56 }
0x10ac   :  { %v2335_v25 = vpop.f32.mrf.mxu0 }
0x10ad   :  { %v2336_v26 = vadd.f32 %v2335_v25, %v4535_v33  ;;  %v3771_v25 = vld [vmem:[%s4831_s12 + $0x80] sm:$0xff]  }
0x10ae   :  { %v3636_v36 = vpop.f32.mrf.mxu0 }
0x10af   :  { %v2342_v40 = vand.u32 2147483647, %v2336_v26  ;;  %v2341_v48 = vmax.f32 %v2336_v26, 0.0  ;;  %v3772_v26 = vld [vmem:[%s4831_s12 + $0x40] sm:$0xff]   ;;  %v3773_v36 = vld [vmem:[%s4831_s12 + $0x78] sm:$0xff]  }
0x10b0   :  { %v2338_v44 = vpop.f32.mrf.mxu0 }
0x10b1   :  { %v2343_v47 = vsub.f32 0.0, %v2342_v40  ;;  %v3774_v40 = vld [vmem:[%s4831_s12 + $0x38] sm:$0xff]   ;;  %v3775_v44 = vld [vmem:[%s4831_s12 + $0x70] sm:$0xff]  }
0x10b2   :  { %v3637_v49 = vpop.f32.mrf.mxu0 }
0x10b3   :  { %v2344_v50 = vmul.f32 1.442695, %v2343_v47  ;;  %v3776_v47 = vld [vmem:[%s4831_s12 + $0x30] sm:$0xff]   ;;  %v3777_v49 = vld [vmem:[%s4831_s12 + $0x68] sm:$0xff]  }
0x10b4   :  { %v2442_v7 = vpop.f32.mrf.mxu0 }
0x10b5   :  { %3843 = vpow2.f32 %v2344_v50  ;;  %v2456_v42 = vpack.c.bf16 %v2442_v7, %v2442_v7  ;;  %v3778_v50 = vld [vmem:[%s4831_s12 + $0x28] sm:$0xff]   ;;  %v3779_v7 = vld [vmem:[%s4831_s12 + $0x60] sm:$0xff]  }
0x10b6   :  { %v3654_v51 = vpop.f32.mrf.mxu0 }
0x10b7   :  { %v3780_v51 = vld [vmem:[%s4831_s12 + $0x20] sm:$0xff]  }
0x10b8   :  { %v2445_v10 = vpop.f32.mrf.mxu0 }
0x10b9   :  { %v2462_v10 = vsub.s32 0, %v4234_v15 }
0x10ba   :  { %v3655_v53 = vpop.f32.mrf.mxu0 }
0x10bb   :  { %v3083_v53 = vld [vmem:[%s4833_s13 + $0x12] ss:$8 sm:$0x3] }
0x10c2   :  { %v3844_v34 = vpop.eup %3843 }
0x10c3   :  { %v2346_v62 = vadd.f32 1.0, %v3844_v34  ;;  %v2349_v63 = vmul.f32 -0.5, %v3844_v34  ;;  %v2352_v45 = vand.u32 2147483647, %v3844_v34 }
0x10c5   :  { %3845 = vlog2.f32 %v2346_v62  ;;  %v2350_v2 = vadd.f32 1.0, %v2349_v63  ;;  %vm2353_vm1 = vcmp.lt.f32.partialorder %v2352_v45, 0.0004427343  ;;  %v2463_v62 = vrot.slane %v3083_v53, %v2462_v10 }
0x10c7   :  { %v2351_v33 = vmul.f32 %v3844_v34, %v2350_v2  ;;  %v2466_v34 = vsub.s32 1, %v4234_v15 }
0x10c9   :  { %v2467_v63 = vrot.slane %v3083_v53, %v2466_v34 }
0x10d2   :  { %v3846_v13 = vpop.eup %3845 }
0x10d3   :  { %v2348_v43 = vmul.f32 0.6931472, %v3846_v13 }
0x10d5   :  { %v2354_v58 = vsel %vm2353_vm1, %v2351_v33, %v2348_v43 }
0x10d6   :  { %v2355_v4 = vadd.f32 %v2354_v58, %v2341_v48 }
0x10d8   :  { %v3079_v14 = vadd.f32 -0.6931472, %v2355_v4 }
0x10da   :  { %v2357_v17 = vpack.c.bf16 %v3079_v14, %v3079_v14 }
0x10dc   :  { %3647 = vmatmul.mubr.msk.bf16.vlgmr.msra.gmra.mxu1 %vm282_vm8, %v2357_v17 }
0x10dd   :  { %2522 = vmatpush1.bf16.msra.mxu1 %v3735_v16  ;;  %2545 = vmatprep.mubr.bf16.mxu1 %v3859_v0 }
0x10de   :  { %2523 = vmatprep.subr.bf16.mxu1 %v3740_v18 }
0x10e1   :  { %2524 = vmatpush1.bf16.msra.mxu1 %v3738_v21 }
0x10e2   :  { %2525 = vmatprep.subr.bf16.mxu1 %v3743_v38 }
0x10e5   :  { %2526 = vmatpush1.bf16.msra.mxu1 %v3741_v39 }
0x10e6   :  { %2527 = vmatprep.subr.bf16.mxu1 %v3746_v22 }
0x10e9   :  { %2528 = vmatpush1.bf16.msra.mxu1 %v3744_v41 }
0x10ea   :  { %2689 = vmatprep.subr.bf16.mxu1 %v3749_v23 }
0x10ec   :  { %3092 = vmatmul.mubr.msk.bf16.vlgmr.msra.gmra.mxu1 %vm282_vm8, %v2456_v42 }
0x10ed   :  { %2690 = vmatpush1.bf16.msra.mxu1 %v3747_v35  ;;  %2709 = vmatprep.mubr.bf16.mxu1 %v3859_v0 }
0x10ee   :  { %2691 = vmatprep.subr.bf16.mxu1 %v3752_v55 }
0x10f1   :  { %2692 = vmatpush1.bf16.msra.mxu1 %v3750_v57 }
0x10f4   :  { %3106 = vmatmul.mubr.msk.bf16.vlgmr.msra.gmra.mxu1 %vm1086_vm6, %v2653_v60  ;;  %vm2947_vm6 = vcmask 1024  }
0x119c   :  { %v2395_v19 = vpop.f32.mrf.mxu1 }
0x119d   :  { %v2396_v0 = vadd.f32 %v2395_v19, %v4552_v54  ;;  %v3765_v54 = vld [vmem:[%s4831_s12 + $0x98] sm:$0xff]  }
0x119e   :  { %v3648_v61 = vpop.f32.mrf.mxu1  ;;  %3280 = vmatprep.subr.bf16.mxu0 %v3765_v54  ;;  %v2786_v54 = vld [vmem:[%s4833_s13 + $0x13] ss:$0 sm:$0xff] }
0x119f   :  { %v2401_v31 = vadd.f32 %v2396_v0, %v4556_v20  ;;  %v3766_v20 = vld [vmem:[%s4831_s12 + $0x58] sm:$0xff]  }
0x11a0   :  { %v2398_v46 = vpop.f32.mrf.mxu1 }
0x11a1   :  { %v2562_v8 = vpack.c.bf16 %v2401_v31, %v2401_v31 }
0x11a2   :  { %v3649_v29 = vpop.f32.mrf.mxu1 }
0x11a3   :  { %3101 = vmatmul.mubr.msk.bf16.vlgmr.msra.gmra.mxu0 %vm282_vm8, %v2562_v8 }
0x11a4   :  { %3281 = vmatpush3.bf16.msra.mxu0 %v3766_v20 }
0x11a5   :  { %3282 = vmatprep.subr.bf16.mxu0 %v3767_v5 }
0x11a8   :  { %3283 = vmatpush3.bf16.msra.mxu0 %v3768_v11 }
0x11a9   :  { %3284 = vmatprep.subr.bf16.mxu0 %v3769_v12 }
0x11ac   :  { %v2547_v37 = vpop.f32.mrf.mxu1  ;;  %3285 = vmatpush3.bf16.msra.mxu0 %v3770_v27 }
0x11ad   :  { %3286 = vmatprep.subr.bf16.mxu0 %v3771_v25  ;;  %v2548_v2 = vadd.f32 %v2547_v37, %v2463_v62 }
0x11ae   :  { %v2549_v9 = vpop.f32.mrf.mxu1 }
0x11af   :  { %v2550_v13 = vadd.f32 %v2549_v9, %v2467_v63  ;;  %v2939_v63 = vld [vmem:[%s4833_s13 + $0x15] ss:$0 sm:$0xff] }
0x11b0   :  { %v2551_v30 = vpop.f32.mrf.mxu1  ;;  %3287 = vmatpush3.bf16.msra.mxu0 %v3772_v26 }
0x11b1   :  { %3288 = vmatprep.subr.bf16.mxu0 %v3773_v36 }
0x11b2   :  { %v2552_v1 = vpop.f32.mrf.mxu1 }
0x11b4   :  { %v2711_v32 = vpop.f32.mrf.mxu1  ;;  %3289 = vmatpush3.bf16.msra.mxu0 %v3774_v40 }
0x11b5   :  { %3290 = vmatprep.subr.bf16.mxu0 %v3775_v44 }
0x11b6   :  { %v2713_v6 = vpop.f32.mrf.mxu1 }
0x11b8   :  { %v2715_v28 = vpop.f32.mrf.mxu1  ;;  %3291 = vmatpush3.bf16.msra.mxu0 %v3776_v47 }
0x11b9   :  { %3292 = vmatprep.subr.bf16.mxu0 %v3777_v49 }
0x11ba   :  { %v2716_v52 = vpop.f32.mrf.mxu1 }
0x11bc   :  { %3293 = vmatpush3.bf16.msra.mxu0 %v3778_v50 }
0x11bd   :  { %3294 = vmatprep.subr.bf16.mxu0 %v3779_v7 }
0x11c0   :  { %3295 = vmatpush3.bf16.msra.mxu0 %v3780_v51 }
0x1263   :  { %v2640_v45 = vpop.f32.mrf.mxu0 }
0x1264   :  { %v2647_v43 = vadd.f32 %v2640_v45, %v2548_v2 }
0x1265   :  { %v2642_v33 = vpop.f32.mrf.mxu0 }
0x1266   :  { %v2718_v48 = vadd.f32 %v2711_v32, %v2647_v43  ;;  %v2648_v58 = vadd.f32 %v2642_v33, %v2550_v13  ;;  %v2945_v43 = vld [vmem:[%s4833_s13 + $0x14] ss:$0 sm:$0xff] }
0x1267   :  { %v2644_v4 = vpop.f32.mrf.mxu0 }
0x1268   :  { %v2722_v14 = vand.u32 2147483647, %v2718_v48  ;;  %v2719_v16 = vadd.f32 %v2713_v6, %v2648_v58  ;;  %v2720_v61 = vmax.f32 %v2718_v48, 0.0 }
0x1269   :  { %v2645_v17 = vpop.f32.mrf.mxu0 }
0x126a   :  { %v2724_v18 = vsub.f32 0.0, %v2722_v14  ;;  %v2723_v21 = vand.u32 2147483647, %v2719_v16  ;;  %v2721_v37 = vmax.f32 %v2719_v16, 0.0 }
0x126c   :  { %v2726_v38 = vmul.f32 1.442695, %v2724_v18  ;;  %v2725_v39 = vsub.f32 0.0, %v2723_v21 }
0x126e   :  { %3847 = vpow2.f32 %v2726_v38  ;;  %v2728_v22 = vmul.f32 1.442695, %v2725_v39 }
0x1270   :  { %3849 = vpow2.f32 %v2728_v22 }
0x127b   :  { %v3848_v15 = vpop.eup %3847 }
0x127c   :  { %v2730_v41 = vadd.f32 1.0, %v3848_v15  ;;  %v2733_v42 = vmul.f32 -0.5, %v3848_v15  ;;  %v2736_v57 = vand.u32 2147483647, %v3848_v15 }
0x127d   :  { %v3850_v23 = vpop.eup %3849 }
0x127e   :  { %3851 = vlog2.f32 %v2730_v41  ;;  %v2739_v35 = vadd.f32 1.0, %v3850_v23  ;;  %v2742_v55 = vmul.f32 -0.5, %v3850_v23  ;;  %v2734_v3 = vadd.f32 1.0, %v2733_v42 }
0x127f   :  { %v2745_v24 = vand.u32 2147483647, %v3850_v23  ;;  %vm2737_vm7 = vcmp.lt.f32.partialorder %v2736_v57, 0.0004427343 }
0x1280   :  { %3853 = vlog2.f32 %v2739_v35  ;;  %v2743_v59 = vadd.f32 1.0, %v2742_v55  ;;  %v2735_v19 = vmul.f32 %v3848_v15, %v2734_v3 }
0x1281   :  { %vm2746_vm8 = vcmp.lt.f32.partialorder %v2745_v24, 0.0004427343 }
0x1282   :  { %v2744_v8 = vmul.f32 %v3850_v23, %v2743_v59 }
0x128b   :  { %v3852_v60 = vpop.eup %3851 }
0x128c   :  { %v2732_v56 = vmul.f32 0.6931472, %v3852_v60 }
0x128d   :  { %v3854_v0 = vpop.eup %3853 }
0x128e   :  { %v2738_v31 = vsel %vm2737_vm7, %v2735_v19, %v2732_v56  ;;  %v2741_v46 = vmul.f32 0.6931472, %v3854_v0 }
0x128f   :  { %v2748_v29 = vadd.f32 %v2738_v31, %v2720_v61 }
0x1290   :  { %v2747_v9 = vsel %vm2746_vm8, %v2744_v8, %v2741_v46 }
0x1291   :  { %v2749_v30 = vadd.f32 %v2747_v9, %v2721_v37  ;;  %v3107_v1 = vadd.f32 -0.6931472, %v2748_v29 }
0x1293   :  { %v3108_v32 = vadd.f32 -0.6931472, %v2749_v30  ;;  %v2784_v28 = vpack.c.bf16 %v3107_v1, %v3107_v1 }
0x1295   :  { %v2785_v6 = vpack.c.bf16 %v3108_v32, %v3108_v32 }
0x1297   :  { %2915 = vmatprep.mubr.bf16.mxu0 %v2785_v6 }
0x1298   :  { %2916 = vmatmul.mubr.bf16.vlgmr.msra.gmra.mxu0 %v2784_v28 }
0x1358   :  { %v3296_v52 = vpop.f32.mrf.mxu0 }
0x135a   :  { %v3297_v20 = vpop.f32.mrf.mxu0 }
0x135b   :  { %v3298_v5 = vadd.f32 %v3297_v20, %v3296_v52 }
0x135c   :  { %v3299_v11 = vpop.f32.mrf.mxu0 }
0x135d   :  { %v2918_v12 = vadd.f32 %v3298_v5, %v2786_v54 }
0x135e   :  { %v3300_v27 = vpop.f32.mrf.mxu0 }
0x135f   :  { %v2924_v25 = vand.u32 2147483647, %v2918_v12  ;;  %v2923_v53 = vmax.f32 %v2918_v12, 0.0 }
0x1361   :  { %v2925_v26 = vsub.f32 0.0, %v2924_v25 }
0x1363   :  { %v2926_v36 = vmul.f32 1.442695, %v2925_v26 }
0x1365   :  { %3855 = vpow2.f32 %v2926_v36 }
0x1372   :  { %v3856_v40 = vpop.eup %3855 }
0x1373   :  { %v2928_v44 = vadd.f32 1.0, %v3856_v40  ;;  %v2931_v47 = vmul.f32 -0.5, %v3856_v40  ;;  %v2934_v50 = vand.u32 2147483647, %v3856_v40 }
0x1375   :  { %3857 = vlog2.f32 %v2928_v44  ;;  %v2932_v49 = vadd.f32 1.0, %v2931_v47  ;;  %vm2935_vm4 = vcmp.lt.f32.partialorder %v2934_v50, 0.0004427343 }
0x1377   :  { %v2933_v10 = vmul.f32 %v3856_v40, %v2932_v49 }
0x1382   :  { %v3858_v7 = vpop.eup %3857 }
0x1383   :  { %v2930_v51 = vmul.f32 0.6931472, %v3858_v7 }
0x1385   :  { %v2936_v34 = vsel %vm2935_vm4, %v2933_v10, %v2930_v51 }
0x1386   :  { %v2937_v62 = vadd.f32 %v2936_v34, %v2923_v53 }
0x1388   :  { %v3125_v2 = vadd.f32 -0.6931472, %v2937_v62 }
0x138a   :  { %v2940_v45 = vmul.f32 %v3125_v2, %v2939_v63 }
0x138c   :  { %v2942_v13 = vsel %vm2941_vm5, %v2940_v45, 0.0 }
0x138d   :  { %2943 = vadd.xlane.f32.xlu0 %v2942_v13 }
0x1416   :  { %v2944_v33 = vpop.xlane.xlu0 %2943 }
0x1417   :  { %v2946_v48 = vadd.f32 %v2945_v43, %v2944_v33 }
0x1419   :  { %2948 = vst.msk [vmem:[%s4838_s14] sm:$0x3] %vm2947_vm6, %v2946_v48 }

</bundles_post_ra>
